<compile_context>
chip_gen: v5e
topology: v5e:2x2
jax: 0.10.0
libtpu: 0.0.40
codegen_flags: <defaults>
</compile_context>

<pallas_src>
import math
import functools

import jax
import jax.numpy as jnp
from jax.experimental import pallas as pl
from jax.experimental.pallas import tpu as pltpu


# ----------------------------------------------------------------------------
# Helpers
# ----------------------------------------------------------------------------
def _layernorm(x, w, b, eps=1e-5):
    mu = jnp.mean(x, axis=-1, keepdims=True)
    var = jnp.mean((x - mu) ** 2, axis=-1, keepdims=True)
    return (x - mu) * jax.lax.rsqrt(var + eps) * w + b


def _round_up(n, m):
    return (n + m - 1) // m * m


def _vmem_limit_bytes():
    # ~75% of physical VMEM per TensorCore, capped at 100 MiB.
    #   v5e/v6e (128 MiB) -> 96 MiB ; v7x (64 MiB) -> 48 MiB.
    cap = 128 * 1024 * 1024
    try:
        info = pltpu.get_tpu_info()
        cap = int(getattr(info, "vmem_capacity_bytes", cap))
    except Exception:
        pass
    return min(cap * 3 // 4, 100 * 1024 * 1024)


# ----------------------------------------------------------------------------
# Kernel: the full transformer stack, one (batch_block, layer) grid step at a
# time.  Residual stream lives in a f32 VMEM scratch across the depth axis.
#   layer 0:   x = prompts + pos
#   per layer: x = x + MHA(ln_1(x), causal);  x = x + c_proj(QuickGELU(c_fc(ln_2(x))))
#   last layer writes x to the output block.
# ----------------------------------------------------------------------------
def stacked_block_kernel(x_ref, pos_ref,
                         ln1w_ref, ln1b_ref, wqkv_ref, bqkv_ref, wo_ref, bo_ref,
                         ln2w_ref, ln2b_ref, wfc_ref, bfc_ref, wproj_ref,
                         bproj_ref, out_ref, x_acc_ref, ctx_ref, *, n_heads):
    l = pl.program_id(1)

    @pl.when(l == 0)
    def _():
        # positional-embedding add fused into the first layer
        x_acc_ref[...] = x_ref[...].astype(jnp.float32) + pos_ref[...]

    x = x_acc_ref[...]                                    # (TB, S, D) f32
    TB, S, D = x.shape
    hd = D // n_heads

    # ---- multi-head self-attention (causal) --------------------------------
    xn = _layernorm(x, ln1w_ref[...], ln1b_ref[...])
    qkv = jnp.dot(xn.reshape(TB * S, D).astype(jnp.bfloat16), wqkv_ref[...],
                  preferred_element_type=jnp.float32) + bqkv_ref[...]
    # attention scale is pre-folded into the q columns of wqkv/bqkv (host).
    qkv = qkv.reshape(TB, S, 3 * D).astype(jnp.bfloat16)  # single bf16 cast
    q = qkv[:, :, :D]
    k = qkv[:, :, D:2 * D]
    v = qkv[:, :, 2 * D:]

    row = jax.lax.broadcasted_iota(jnp.int32, (S, S), 0)
    col = jax.lax.broadcasted_iota(jnp.int32, (S, S), 1)
    causal = (col <= row)[None]                           # (1, S, S)

    for h in range(n_heads):                              # static unroll (H small)
        qh = q[:, :, h * hd:(h + 1) * hd]
        kh = k[:, :, h * hd:(h + 1) * hd]
        vh = v[:, :, h * hd:(h + 1) * hd]
        s = jnp.einsum("bqd,bkd->bqk", qh, kh,
                       preferred_element_type=jnp.float32)   # (TB, S, S) f32
        s = jnp.where(causal, s, -jnp.inf)
        s = s - jnp.max(s, axis=-1, keepdims=True)
        p = jnp.exp(s)
        p = p * pl.reciprocal(jnp.sum(p, axis=-1, keepdims=True), approx=True)
        oh = jnp.einsum("bqk,bkd->bqd", p.astype(jnp.bfloat16), vh,
                        preferred_element_type=jnp.float32)  # (TB, S, hd)
        ctx_ref[:, :, h * hd:(h + 1) * hd] = oh.astype(jnp.bfloat16)

    # single K=D output projection (concat @ Wo^T, weights pre-transposed)
    attn = jnp.dot(ctx_ref[...].reshape(TB * S, D), wo_ref[...],
                   preferred_element_type=jnp.float32) + bo_ref[...]
    x = x + attn.reshape(TB, S, D)

    # ---- MLP: c_fc -> QuickGELU -> c_proj ----------------------------------
    xn2 = _layernorm(x, ln2w_ref[...], ln2b_ref[...])
    h1 = jnp.dot(xn2.reshape(TB * S, D).astype(jnp.bfloat16), wfc_ref[...],
                 preferred_element_type=jnp.float32) + bfc_ref[...]
    h1 = h1 * jax.nn.sigmoid(1.702 * h1)                  # QuickGELU (f32)
    h2 = jnp.dot(h1.astype(jnp.bfloat16), wproj_ref[...],
                 preferred_element_type=jnp.float32) + bproj_ref[...]
    x = x + h2.reshape(TB, S, D)

    x_acc_ref[...] = x                                     # carry residual

    @pl.when(l == pl.num_programs(1) - 1)
    def _():
        out_ref[...] = x.astype(out_ref.dtype)


def transformer_stack(x, pos, stacked, n_heads, *, depth, tb):
    B, S, D = x.shape
    assert B % tb == 0

    def const_spec(arr):                        # same block every grid step
        nd = arr.ndim
        return pl.BlockSpec(arr.shape, lambda i, l, _nd=nd: (0,) * _nd)

    def layer_spec(arr):                        # (depth, r0, r1) -> pick layer l
        _, r0, r1 = arr.shape
        return pl.BlockSpec((None, r0, r1), lambda i, l: (l, 0, 0))

    x_spec = pl.BlockSpec((tb, S, D), lambda i, l: (i, 0, 0))

    names = ["ln1_w", "ln1_b", "wqkv", "bqkv", "wo", "bo",
             "ln2_w", "ln2_b", "wfc", "bfc", "wproj", "bproj"]
    weights = [stacked[n] for n in names]

    return pl.pallas_call(
        functools.partial(stacked_block_kernel, n_heads=n_heads),
        out_shape=jax.ShapeDtypeStruct((B, S, D), x.dtype),
        grid=(B // tb, depth),
        in_specs=[x_spec, const_spec(pos)] + [layer_spec(w) for w in weights],
        out_specs=x_spec,
        scratch_shapes=[pltpu.VMEM((tb, S, D), jnp.float32),    # residual
                        pltpu.VMEM((tb, S, D), jnp.bfloat16)],  # head concat
        compiler_params=pltpu.CompilerParams(
            # batch blocks across TCs (v7x); depth axis carries the residual
            dimension_semantics=("parallel", "arbitrary"),
            vmem_limit_bytes=_vmem_limit_bytes()),
    )(x, pos, *weights)


# ----------------------------------------------------------------------------
# Kernel: ln_final on gathered EOT tokens + text_projection matmul,
# blocked over the batch axis.  (LN is per-token, so LN(gather(x)) == gather(LN(x)).)
# ----------------------------------------------------------------------------
def head_kernel(xe_ref, lnw_ref, lnb_ref, proj_ref, out_ref):
    xn = _layernorm(xe_ref[...].astype(jnp.float32), lnw_ref[...], lnb_ref[...])
    out_ref[...] = jnp.dot(xn.astype(jnp.bfloat16), proj_ref[...],
                           preferred_element_type=jnp.float32
                           ).astype(out_ref.dtype)


def head(xe, lnw, lnb, proj, *, tbh=8):
    B, D = xe.shape
    P = proj.shape[1]
    B_pad = _round_up(B, tbh)
    xe_p = jnp.pad(xe, ((0, B_pad - B), (0, 0)))
    out = pl.pallas_call(
        head_kernel,
        out_shape=jax.ShapeDtypeStruct((B_pad, P), jnp.float32),
        grid=(B_pad // tbh,),
        in_specs=[pl.BlockSpec((tbh, D), lambda i: (i, 0)),
                  pl.BlockSpec((1, D), lambda i: (0, 0)),
                  pl.BlockSpec((1, D), lambda i: (0, 0)),
                  pl.BlockSpec((D, P), lambda i: (0, 0))],
        out_specs=pl.BlockSpec((tbh, P), lambda i: (i, 0)),
        compiler_params=pltpu.CompilerParams(
            dimension_semantics=("parallel",),
            vmem_limit_bytes=_vmem_limit_bytes()),
    )(xe_p, lnw, lnb, proj)
    return out[:B]


# ----------------------------------------------------------------------------
# Host-side parameter stacking: leading depth axis + attention-scale fold.
# ----------------------------------------------------------------------------
def _stack_layer_params(layers, n_heads):
    D = layers[0]["wqkv"].shape[0]
    hd = D // n_heads
    scale = 1.0 / math.sqrt(hd)

    names = ["ln1_w", "ln1_b", "wqkv", "bqkv", "wo", "bo",
             "ln2_w", "ln2_b", "wfc", "bfc", "wproj", "bproj"]
    stacked = {n: jnp.stack([lp[n] for lp in layers], axis=0) for n in names}

    # fold 1/sqrt(hd) into the q columns of wqkv / bqkv (zero runtime cost)
    wqkv = stacked["wqkv"].astype(jnp.float32)
    wqkv = wqkv.at[:, :, :D].multiply(scale)
    stacked["wqkv"] = wqkv.astype(jnp.bfloat16)
    stacked["bqkv"] = stacked["bqkv"].at[:, :, :D].multiply(scale)
    return stacked


# ----------------------------------------------------------------------------
# Full forward
# ----------------------------------------------------------------------------
def text_encoder_forward(prompts, tokenized_prompts, params, n_heads, *, tb=None):
    B, S, D = prompts.shape
    depth = len(params["layers"])

    # keep >= 2 grid steps along the "parallel" batch axis (2 TCs on v7x)
    if tb is None:
        tb = max(1, min(8, B // 2))
    B_pad = _round_up(B, tb)
    S_pad = _round_up(S, 8)

    x = jnp.pad(prompts, ((0, B_pad - B), (0, S_pad - S), (0, 0)))
    pos = jnp.pad(params["pos_emb"], ((0, S_pad - S), (0, 0)))
    stacked = _stack_layer_params(params["layers"], n_heads)

    x = transformer_stack(x, pos, stacked, n_heads, depth=depth, tb=tb)

    x = x[:B, :S]
    # glue: x[arange(B), tokenized_prompts.argmax(-1)]
    eot = jnp.argmax(tokenized_prompts, axis=-1)
    xe = x[jnp.arange(B), eot]                            # (B, D)
    return head(xe, params["lnf_w"], params["lnf_b"], params["text_proj"])


# ----------------------------------------------------------------------------
# Deterministic synthetic parameters (CLIP text-tower shapes).
# Weights stored PRE-TRANSPOSED (x @ W layout) and in bf16 for the MXU.
# ----------------------------------------------------------------------------
def init_params(key, depth, S, D, P):
    keys = iter(jax.random.split(key, 4 * depth + 2))

    def w(shape, scale=0.02):
        return (scale * jax.random.normal(next(keys), shape)).astype(jnp.bfloat16)

    params = {
        "pos_emb": (0.01 * jax.random.normal(next(keys), (S, D))
                    ).astype(jnp.float32),
        "lnf_w": jnp.ones((1, D), jnp.float32),
        "lnf_b": jnp.zeros((1, D), jnp.float32),
        "text_proj": w((D, P)),
        "layers": [],
    }
    for _ in range(depth):
        params["layers"].append({
            "ln1_w": jnp.ones((1, D), jnp.float32),
            "ln1_b": jnp.zeros((1, D), jnp.float32),
            "wqkv": w((D, 3 * D)),               # pre-transposed
            "bqkv": jnp.zeros((1, 3 * D), jnp.float32),
            "wo": w((D, D)),                     # pre-transposed (== Wo^T)
            "bo": jnp.zeros((1, D), jnp.float32),
            "ln2_w": jnp.ones((1, D), jnp.float32),
            "ln2_b": jnp.zeros((1, D), jnp.float32),
            "wfc": w((D, 4 * D)),                # pre-transposed
            "bfc": jnp.zeros((1, 4 * D), jnp.float32),
            "wproj": w((4 * D, D)),              # pre-transposed
            "bproj": jnp.zeros((1, D), jnp.float32),
        })
    return params


# ----------------------------------------------------------------------------
# Pure-JAX reference (f32 math, same bf16-stored weights) for a sanity check
# ----------------------------------------------------------------------------
def _ln_ref(x, w, b, eps=1e-5):
    mu = x.mean(-1, keepdims=True)
    var = ((x - mu) ** 2).mean(-1, keepdims=True)
    return (x - mu) * jax.lax.rsqrt(var + eps) * w + b


def reference_forward(prompts, tokenized, params, n_heads):
    f32 = lambda a: a.astype(jnp.float32)
    x = prompts + params["pos_emb"][None]
    B, S, D = x.shape
    hd = D // n_heads
    scale = 1.0 / math.sqrt(hd)
    causal = jnp.tril(jnp.ones((S, S), bool))
    for lp in params["layers"]:
        xn = _ln_ref(x, lp["ln1_w"], lp["ln1_b"])
        qkv = xn @ f32(lp["wqkv"]) + lp["bqkv"]
        q, k, v = jnp.split(qkv, 3, axis=-1)
        q = q.reshape(B, S, n_heads, hd).transpose(0, 2, 1, 3) * scale
        k = k.reshape(B, S, n_heads, hd).transpose(0, 2, 1, 3)
        v = v.reshape(B, S, n_heads, hd).transpose(0, 2, 1, 3)
        s = jnp.einsum("bhqd,bhkd->bhqk", q, k)
        s = jnp.where(causal[None, None], s, -jnp.inf)
        p = jax.nn.softmax(s, axis=-1)
        a = jnp.einsum("bhqk,bhkd->bhqd", p, v)
        a = a.transpose(0, 2, 1, 3).reshape(B, S, D)
        x = x + a @ f32(lp["wo"]) + lp["bo"]
        xn2 = _ln_ref(x, lp["ln2_w"], lp["ln2_b"])
        h1 = xn2 @ f32(lp["wfc"]) + lp["bfc"]
        h1 = h1 * jax.nn.sigmoid(1.702 * h1)
        x = x + h1 @ f32(lp["wproj"]) + lp["bproj"]
    x = _ln_ref(x, params["lnf_w"], params["lnf_b"])
    eot = jnp.argmax(tokenized, axis=-1)
    return x[jnp.arange(B), eot] @ f32(params["text_proj"])


# ----------------------------------------------------------------------------
if __name__ == "__main__":
    B, S, D, H, P, DEPTH = 2, 8, 32, 4, 16, 2   # small CLIP-text-like shapes

    key = jax.random.PRNGKey(0)
    kp, kx, kt = jax.random.split(key, 3)
    params = init_params(kp, DEPTH, S, D, P)
    prompts = jax.random.normal(kx, (B, S, D), jnp.float32)
    tokenized_prompts = jax.random.randint(kt, (B, S), 0, 100).astype(jnp.int32)

    out = text_encoder_forward(prompts, tokenized_prompts, params, H)
    out = jax.block_until_ready(out)

    ref = reference_forward(prompts, tokenized_prompts, params, H)
    assert out.shape == (B, P), out.shape
    max_err = float(jnp.max(jnp.abs(out - ref)))
    # bf16 matmul operands + approx reciprocal + host-folded scale -> widened tol
    assert jnp.allclose(out, ref, atol=2e-2, rtol=2e-2), max_err

    print("KERNEL_OK")
</pallas_src>

<mosaic_0001>
module attributes {stable_mosaic.version = 11 : i64} {
  func.func @stacked_block_kernel(%arg0: i32, %arg1: i32, %arg2: memref<1x8x32xf32, #tpu.memory_space<vmem>>, %arg3: memref<8x32xf32, #tpu.memory_space<vmem>>, %arg4: memref<1x1x32xf32, #tpu.memory_space<vmem>>, %arg5: memref<1x1x32xf32, #tpu.memory_space<vmem>>, %arg6: memref<1x32x96xbf16, #tpu.memory_space<vmem>>, %arg7: memref<1x1x96xf32, #tpu.memory_space<vmem>>, %arg8: memref<1x32x32xbf16, #tpu.memory_space<vmem>>, %arg9: memref<1x1x32xf32, #tpu.memory_space<vmem>>, %arg10: memref<1x1x32xf32, #tpu.memory_space<vmem>>, %arg11: memref<1x1x32xf32, #tpu.memory_space<vmem>>, %arg12: memref<1x32x128xbf16, #tpu.memory_space<vmem>>, %arg13: memref<1x1x128xf32, #tpu.memory_space<vmem>>, %arg14: memref<1x128x32xbf16, #tpu.memory_space<vmem>>, %arg15: memref<1x1x32xf32, #tpu.memory_space<vmem>>, %arg16: memref<1x8x32xf32, #tpu.memory_space<vmem>>, %arg17: memref<1x8x32xf32, #tpu.memory_space<vmem>>, %arg18: memref<1x8x32xbf16, #tpu.memory_space<vmem>>) attributes {dimension_semantics = [#tpu.dimension_semantics<parallel>, #tpu.dimension_semantics<arbitrary>], iteration_bounds = array<i64: 2, 2>, scalar_prefetch = 0 : i64, scratch_operands = 2 : i64, tpu.core_type = #tpu.core_type<tc>, window_params = [{transform_indices = @transform_0, window_bounds = array<i64: 1, 8, 32>}, {pipeline_mode = #tpu.pipeline_mode<synchronous>, transform_indices = @transform_1, window_bounds = array<i64: 8, 32>}, {transform_indices = @transform_2, window_bounds = array<i64: 1, 1, 32>}, {transform_indices = @transform_3, window_bounds = array<i64: 1, 1, 32>}, {transform_indices = @transform_4, window_bounds = array<i64: 1, 32, 96>}, {transform_indices = @transform_5, window_bounds = array<i64: 1, 1, 96>}, {transform_indices = @transform_6, window_bounds = array<i64: 1, 32, 32>}, {transform_indices = @transform_7, window_bounds = array<i64: 1, 1, 32>}, {transform_indices = @transform_8, window_bounds = array<i64: 1, 1, 32>}, {transform_indices = @transform_9, window_bounds = array<i64: 1, 1, 32>}, {transform_indices = @transform_10, window_bounds = array<i64: 1, 32, 128>}, {transform_indices = @transform_11, window_bounds = array<i64: 1, 1, 128>}, {transform_indices = @transform_12, window_bounds = array<i64: 1, 128, 32>}, {transform_indices = @transform_13, window_bounds = array<i64: 1, 1, 32>}, {transform_indices = @transform_14, window_bounds = array<i64: 1, 8, 32>}]} {
    %c0_i32 = arith.constant 0 : i32
    %0 = arith.cmpi eq, %arg1, %c0_i32 : i32
    %1 = arith.extui %0 : i1 to i32
    %c0_i32_0 = arith.constant 0 : i32
    %2 = arith.cmpi ne, %1, %c0_i32_0 : i32
    scf.if %2 {
      %c0_90 = arith.constant 0 : index
      %c0_91 = arith.constant 0 : index
      %c0_92 = arith.constant 0 : index
      %200 = vector.load %arg2[%c0_90, %c0_91, %c0_92] : memref<1x8x32xf32, #tpu.memory_space<vmem>>, vector<1x8x32xf32>
      %c0_93 = arith.constant 0 : index
      %c0_94 = arith.constant 0 : index
      %201 = vector.load %arg3[%c0_93, %c0_94] : memref<8x32xf32, #tpu.memory_space<vmem>>, vector<8x32xf32>
      %202 = vector.shape_cast %201 : vector<8x32xf32> to vector<1x8x32xf32>
      %203 = arith.addf %200, %202 : vector<1x8x32xf32>
      %c0_95 = arith.constant 0 : index
      %c0_96 = arith.constant 0 : index
      %c0_97 = arith.constant 0 : index
      %204 = vector.load %arg17[%c0_95, %c0_96, %c0_97] : memref<1x8x32xf32, #tpu.memory_space<vmem>>, vector<1x8x32xf32>
      tpu.vector_store %arg17[%c0_95, %c0_96, %c0_97], %203 {strides = array<i32>} : memref<1x8x32xf32, #tpu.memory_space<vmem>>, vector<1x8x32xf32>,
    } else {
    }
    %c0 = arith.constant 0 : index
    %c0_1 = arith.constant 0 : index
    %c0_2 = arith.constant 0 : index
    %3 = vector.load %arg17[%c0, %c0_1, %c0_2] : memref<1x8x32xf32, #tpu.memory_space<vmem>>, vector<1x8x32xf32>
    %c0_3 = arith.constant 0 : index
    %c0_4 = arith.constant 0 : index
    %c0_5 = arith.constant 0 : index
    %4 = vector.load %arg4[%c0_3, %c0_4, %c0_5] : memref<1x1x32xf32, #tpu.memory_space<vmem>>, vector<1x1x32xf32>
    %5 = vector.shape_cast %4 : vector<1x1x32xf32> to vector<1x32xf32>
    %c0_6 = arith.constant 0 : index
    %c0_7 = arith.constant 0 : index
    %c0_8 = arith.constant 0 : index
    %6 = vector.load %arg5[%c0_6, %c0_7, %c0_8] : memref<1x1x32xf32, #tpu.memory_space<vmem>>, vector<1x1x32xf32>
    %7 = vector.shape_cast %6 : vector<1x1x32xf32> to vector<1x32xf32>
    %cst = arith.constant dense<0.000000e+00> : vector<1x8xf32>
    %8 = vector.multi_reduction <add>, %3, %cst [2] : vector<1x8x32xf32> to vector<1x8xf32>
    %9 = vector.shape_cast %8 : vector<1x8xf32> to vector<1x8x1xf32>
    %cst_9 = arith.constant 3.200000e+01 : f32
    %10 = vector.broadcast %cst_9 : f32 to vector<1x8x1xf32>
    %11 = arith.divf %9, %10 : vector<1x8x1xf32>
    %12 = vector.broadcast %11 : vector<1x8x1xf32> to vector<1x8x32xf32>
    %13 = arith.subf %3, %12 : vector<1x8x32xf32>
    %14 = arith.mulf %13, %13 : vector<1x8x32xf32>
    %cst_10 = arith.constant dense<0.000000e+00> : vector<1x8xf32>
    %15 = vector.multi_reduction <add>, %14, %cst_10 [2] : vector<1x8x32xf32> to vector<1x8xf32>
    %16 = vector.shape_cast %15 : vector<1x8xf32> to vector<1x8x1xf32>
    %cst_11 = arith.constant 3.200000e+01 : f32
    %17 = vector.broadcast %cst_11 : f32 to vector<1x8x1xf32>
    %18 = arith.divf %16, %17 : vector<1x8x1xf32>
    %19 = vector.broadcast %11 : vector<1x8x1xf32> to vector<1x8x32xf32>
    %20 = arith.subf %3, %19 : vector<1x8x32xf32>
    %cst_12 = arith.constant 9.99999974E-6 : f32
    %21 = vector.broadcast %cst_12 : f32 to vector<1x8x1xf32>
    %22 = arith.addf %18, %21 : vector<1x8x1xf32>
    %23 = math.rsqrt %22 : vector<1x8x1xf32>
    %24 = vector.broadcast %23 : vector<1x8x1xf32> to vector<1x8x32xf32>
    %25 = arith.mulf %20, %24 : vector<1x8x32xf32>
    %26 = vector.shape_cast %5 : vector<1x32xf32> to vector<1x1x32xf32>
    %27 = vector.broadcast %26 : vector<1x1x32xf32> to vector<1x8x32xf32>
    %28 = arith.mulf %25, %27 : vector<1x8x32xf32>
    %29 = vector.shape_cast %7 : vector<1x32xf32> to vector<1x1x32xf32>
    %30 = vector.broadcast %29 : vector<1x1x32xf32> to vector<1x8x32xf32>
    %31 = arith.addf %28, %30 : vector<1x8x32xf32>
    %32 = vector.shape_cast %31 : vector<1x8x32xf32> to vector<8x32xf32>
    %33 = arith.truncf %32 : vector<8x32xf32> to vector<8x32xbf16>
    %c0_13 = arith.constant 0 : index
    %c0_14 = arith.constant 0 : index
    %c0_15 = arith.constant 0 : index
    %34 = vector.load %arg6[%c0_13, %c0_14, %c0_15] : memref<1x32x96xbf16, #tpu.memory_space<vmem>>, vector<1x32x96xbf16>
    %35 = vector.shape_cast %34 : vector<1x32x96xbf16> to vector<32x96xbf16>
    %cst_16 = arith.constant dense<0.000000e+00> : vector<8x96xf32>
    %36 = tpu.matmul %33, %35, %cst_16 {dimension_numbers = #tpu.dot_dimension_numbers<[1], [0], [0], [1], [0, 0, 1, 1], [], []>} : vector<8x32xbf16>, vector<32x96xbf16>, vector<8x96xf32> -> vector<8x96xf32>
    %c0_17 = arith.constant 0 : index
    %c0_18 = arith.constant 0 : index
    %c0_19 = arith.constant 0 : index
    %37 = vector.load %arg7[%c0_17, %c0_18, %c0_19] : memref<1x1x96xf32, #tpu.memory_space<vmem>>, vector<1x1x96xf32>
    %38 = vector.shape_cast %37 : vector<1x1x96xf32> to vector<1x96xf32>
    %39 = vector.broadcast %38 : vector<1x96xf32> to vector<8x96xf32>
    %40 = arith.addf %36, %39 : vector<8x96xf32>
    %41 = vector.shape_cast %40 : vector<8x96xf32> to vector<1x8x96xf32>
    %42 = arith.truncf %41 : vector<1x8x96xf32> to vector<1x8x96xbf16>
    %43 = vector.extract_strided_slice %42 {offsets = [0, 0, 0], sizes = [1, 8, 32], strides = [1, 1, 1]} : vector<1x8x96xbf16> to vector<1x8x32xbf16>
    %44 = vector.extract_strided_slice %42 {offsets = [0, 0, 32], sizes = [1, 8, 32], strides = [1, 1, 1]} : vector<1x8x96xbf16> to vector<1x8x32xbf16>
    %45 = vector.extract_strided_slice %42 {offsets = [0, 0, 64], sizes = [1, 8, 32], strides = [1, 1, 1]} : vector<1x8x96xbf16> to vector<1x8x32xbf16>
    %46 = tpu.iota {dimensions = array<i32: 0>} : vector<8x8xi32>
    %47 = tpu.iota {dimensions = array<i32: 1>} : vector<8x8xi32>
    %48 = arith.cmpi sle, %47, %46 : vector<8x8xi32>
    %49 = vector.shape_cast %48 : vector<8x8xi1> to vector<1x8x8xi1>
    %50 = vector.extract_strided_slice %43 {offsets = [0, 0, 0], sizes = [1, 8, 8], strides = [1, 1, 1]} : vector<1x8x32xbf16> to vector<1x8x8xbf16>
    %51 = vector.extract_strided_slice %44 {offsets = [0, 0, 0], sizes = [1, 8, 8], strides = [1, 1, 1]} : vector<1x8x32xbf16> to vector<1x8x8xbf16>
    %52 = vector.extract_strided_slice %45 {offsets = [0, 0, 0], sizes = [1, 8, 8], strides = [1, 1, 1]} : vector<1x8x32xbf16> to vector<1x8x8xbf16>
    "tpu.trace_start"() <{level = 10 : i32, message = "bqd,bkd->bqk"}> : () -> ()
    %cst_20 = arith.constant dense<0.000000e+00> : vector<1x8x8xf32>
    %53 = tpu.matmul %50, %51, %cst_20 {dimension_numbers = #tpu.dot_dimension_numbers<[2], [2], [1], [1], [0, 0, 0, 1, 1, 1], [0], [0]>} : vector<1x8x8xbf16>, vector<1x8x8xbf16>, vector<1x8x8xf32> -> vector<1x8x8xf32>
    %cst_21 = arith.constant 0xFF800000 : f32
    "tpu.trace_stop"() : () -> ()
    %54 = vector.broadcast %cst_21 : f32 to vector<1x8x8xf32>
    %55 = arith.select %49, %53, %54 : vector<1x8x8xi1>, vector<1x8x8xf32>
    %cst_22 = arith.constant dense<0xFF800000> : vector<1x8xf32>
    %56 = vector.multi_reduction <maximumf>, %55, %cst_22 [2] : vector<1x8x8xf32> to vector<1x8xf32>
    %57 = vector.shape_cast %56 : vector<1x8xf32> to vector<1x8x1xf32>
    %58 = vector.broadcast %57 : vector<1x8x1xf32> to vector<1x8x8xf32>
    %59 = arith.subf %55, %58 : vector<1x8x8xf32>
    %60 = math.exp %59 : vector<1x8x8xf32>
    %cst_23 = arith.constant dense<0.000000e+00> : vector<1x8xf32>
    %61 = vector.multi_reduction <add>, %60, %cst_23 [2] : vector<1x8x8xf32> to vector<1x8xf32>
    %62 = vector.shape_cast %61 : vector<1x8xf32> to vector<1x8x1xf32>
    %63 = tpu.reciprocal %62 {approx = true} : vector<1x8x1xf32> -> vector<1x8x1xf32>
    %64 = vector.broadcast %63 : vector<1x8x1xf32> to vector<1x8x8xf32>
    %65 = arith.mulf %60, %64 : vector<1x8x8xf32>
    %66 = arith.truncf %65 : vector<1x8x8xf32> to vector<1x8x8xbf16>
    "tpu.trace_start"() <{level = 10 : i32, message = "bqk,bkd->bqd"}> : () -> ()
    %cst_24 = arith.constant dense<0.000000e+00> : vector<1x8x8xf32>
    %67 = tpu.matmul %66, %52, %cst_24 {dimension_numbers = #tpu.dot_dimension_numbers<[2], [1], [1], [2], [0, 0, 0, 1, 1, 2], [0], [0]>} : vector<1x8x8xbf16>, vector<1x8x8xbf16>, vector<1x8x8xf32> -> vector<1x8x8xf32>
    "tpu.trace_stop"() : () -> ()
    %68 = arith.truncf %67 : vector<1x8x8xf32> to vector<1x8x8xbf16>
    %c0_25 = arith.constant 0 : index
    %c0_26 = arith.constant 0 : index
    %c0_27 = arith.constant 0 : index
    %69 = vector.load %arg18[%c0_25, %c0_26, %c0_27] : memref<1x8x32xbf16, #tpu.memory_space<vmem>>, vector<1x8x8xbf16>
    tpu.vector_store %arg18[%c0_25, %c0_26, %c0_27], %68 {strides = array<i32>} : memref<1x8x32xbf16, #tpu.memory_space<vmem>>, vector<1x8x8xbf16>,
    %70 = vector.extract_strided_slice %43 {offsets = [0, 0, 8], sizes = [1, 8, 8], strides = [1, 1, 1]} : vector<1x8x32xbf16> to vector<1x8x8xbf16>
    %71 = vector.extract_strided_slice %44 {offsets = [0, 0, 8], sizes = [1, 8, 8], strides = [1, 1, 1]} : vector<1x8x32xbf16> to vector<1x8x8xbf16>
    %72 = vector.extract_strided_slice %45 {offsets = [0, 0, 8], sizes = [1, 8, 8], strides = [1, 1, 1]} : vector<1x8x32xbf16> to vector<1x8x8xbf16>
    "tpu.trace_start"() <{level = 10 : i32, message = "bqd,bkd->bqk"}> : () -> ()
    %cst_28 = arith.constant dense<0.000000e+00> : vector<1x8x8xf32>
    %73 = tpu.matmul %70, %71, %cst_28 {dimension_numbers = #tpu.dot_dimension_numbers<[2], [2], [1], [1], [0, 0, 0, 1, 1, 1], [0], [0]>} : vector<1x8x8xbf16>, vector<1x8x8xbf16>, vector<1x8x8xf32> -> vector<1x8x8xf32>
    %cst_29 = arith.constant 0xFF800000 : f32
    "tpu.trace_stop"() : () -> ()
    %74 = vector.broadcast %cst_29 : f32 to vector<1x8x8xf32>
    %75 = arith.select %49, %73, %74 : vector<1x8x8xi1>, vector<1x8x8xf32>
    %cst_30 = arith.constant dense<0xFF800000> : vector<1x8xf32>
    %76 = vector.multi_reduction <maximumf>, %75, %cst_30 [2] : vector<1x8x8xf32> to vector<1x8xf32>
    %77 = vector.shape_cast %76 : vector<1x8xf32> to vector<1x8x1xf32>
    %78 = vector.broadcast %77 : vector<1x8x1xf32> to vector<1x8x8xf32>
    %79 = arith.subf %75, %78 : vector<1x8x8xf32>
    %80 = math.exp %79 : vector<1x8x8xf32>
    %cst_31 = arith.constant dense<0.000000e+00> : vector<1x8xf32>
    %81 = vector.multi_reduction <add>, %80, %cst_31 [2] : vector<1x8x8xf32> to vector<1x8xf32>
    %82 = vector.shape_cast %81 : vector<1x8xf32> to vector<1x8x1xf32>
    %83 = tpu.reciprocal %82 {approx = true} : vector<1x8x1xf32> -> vector<1x8x1xf32>
    %84 = vector.broadcast %83 : vector<1x8x1xf32> to vector<1x8x8xf32>
    %85 = arith.mulf %80, %84 : vector<1x8x8xf32>
    %86 = arith.truncf %85 : vector<1x8x8xf32> to vector<1x8x8xbf16>
    "tpu.trace_start"() <{level = 10 : i32, message = "bqk,bkd->bqd"}> : () -> ()
    %cst_32 = arith.constant dense<0.000000e+00> : vector<1x8x8xf32>
    %87 = tpu.matmul %86, %72, %cst_32 {dimension_numbers = #tpu.dot_dimension_numbers<[2], [1], [1], [2], [0, 0, 0, 1, 1, 2], [0], [0]>} : vector<1x8x8xbf16>, vector<1x8x8xbf16>, vector<1x8x8xf32> -> vector<1x8x8xf32>
    "tpu.trace_stop"() : () -> ()
    %88 = arith.truncf %87 : vector<1x8x8xf32> to vector<1x8x8xbf16>
    %c0_33 = arith.constant 0 : index
    %c0_34 = arith.constant 0 : index
    %c8 = arith.constant 8 : index
    %89 = vector.load %arg18[%c0_33, %c0_34, %c8] : memref<1x8x32xbf16, #tpu.memory_space<vmem>>, vector<1x8x8xbf16>
    tpu.vector_store %arg18[%c0_33, %c0_34, %c8], %88 {strides = array<i32>} : memref<1x8x32xbf16, #tpu.memory_space<vmem>>, vector<1x8x8xbf16>,
    %90 = vector.extract_strided_slice %43 {offsets = [0, 0, 16], sizes = [1, 8, 8], strides = [1, 1, 1]} : vector<1x8x32xbf16> to vector<1x8x8xbf16>
    %91 = vector.extract_strided_slice %44 {offsets = [0, 0, 16], sizes = [1, 8, 8], strides = [1, 1, 1]} : vector<1x8x32xbf16> to vector<1x8x8xbf16>
    %92 = vector.extract_strided_slice %45 {offsets = [0, 0, 16], sizes = [1, 8, 8], strides = [1, 1, 1]} : vector<1x8x32xbf16> to vector<1x8x8xbf16>
    "tpu.trace_start"() <{level = 10 : i32, message = "bqd,bkd->bqk"}> : () -> ()
    %cst_35 = arith.constant dense<0.000000e+00> : vector<1x8x8xf32>
    %93 = tpu.matmul %90, %91, %cst_35 {dimension_numbers = #tpu.dot_dimension_numbers<[2], [2], [1], [1], [0, 0, 0, 1, 1, 1], [0], [0]>} : vector<1x8x8xbf16>, vector<1x8x8xbf16>, vector<1x8x8xf32> -> vector<1x8x8xf32>
    %cst_36 = arith.constant 0xFF800000 : f32
    "tpu.trace_stop"() : () -> ()
    %94 = vector.broadcast %cst_36 : f32 to vector<1x8x8xf32>
    %95 = arith.select %49, %93, %94 : vector<1x8x8xi1>, vector<1x8x8xf32>
    %cst_37 = arith.constant dense<0xFF800000> : vector<1x8xf32>
    %96 = vector.multi_reduction <maximumf>, %95, %cst_37 [2] : vector<1x8x8xf32> to vector<1x8xf32>
    %97 = vector.shape_cast %96 : vector<1x8xf32> to vector<1x8x1xf32>
    %98 = vector.broadcast %97 : vector<1x8x1xf32> to vector<1x8x8xf32>
    %99 = arith.subf %95, %98 : vector<1x8x8xf32>
    %100 = math.exp %99 : vector<1x8x8xf32>
    %cst_38 = arith.constant dense<0.000000e+00> : vector<1x8xf32>
    %101 = vector.multi_reduction <add>, %100, %cst_38 [2] : vector<1x8x8xf32> to vector<1x8xf32>
    %102 = vector.shape_cast %101 : vector<1x8xf32> to vector<1x8x1xf32>
    %103 = tpu.reciprocal %102 {approx = true} : vector<1x8x1xf32> -> vector<1x8x1xf32>
    %104 = vector.broadcast %103 : vector<1x8x1xf32> to vector<1x8x8xf32>
    %105 = arith.mulf %100, %104 : vector<1x8x8xf32>
    %106 = arith.truncf %105 : vector<1x8x8xf32> to vector<1x8x8xbf16>
    "tpu.trace_start"() <{level = 10 : i32, message = "bqk,bkd->bqd"}> : () -> ()
    %cst_39 = arith.constant dense<0.000000e+00> : vector<1x8x8xf32>
    %107 = tpu.matmul %106, %92, %cst_39 {dimension_numbers = #tpu.dot_dimension_numbers<[2], [1], [1], [2], [0, 0, 0, 1, 1, 2], [0], [0]>} : vector<1x8x8xbf16>, vector<1x8x8xbf16>, vector<1x8x8xf32> -> vector<1x8x8xf32>
    "tpu.trace_stop"() : () -> ()
    %108 = arith.truncf %107 : vector<1x8x8xf32> to vector<1x8x8xbf16>
    %c0_40 = arith.constant 0 : index
    %c0_41 = arith.constant 0 : index
    %c16 = arith.constant 16 : index
    %109 = vector.load %arg18[%c0_40, %c0_41, %c16] : memref<1x8x32xbf16, #tpu.memory_space<vmem>>, vector<1x8x8xbf16>
    tpu.vector_store %arg18[%c0_40, %c0_41, %c16], %108 {strides = array<i32>} : memref<1x8x32xbf16, #tpu.memory_space<vmem>>, vector<1x8x8xbf16>,
    %110 = vector.extract_strided_slice %43 {offsets = [0, 0, 24], sizes = [1, 8, 8], strides = [1, 1, 1]} : vector<1x8x32xbf16> to vector<1x8x8xbf16>
    %111 = vector.extract_strided_slice %44 {offsets = [0, 0, 24], sizes = [1, 8, 8], strides = [1, 1, 1]} : vector<1x8x32xbf16> to vector<1x8x8xbf16>
    %112 = vector.extract_strided_slice %45 {offsets = [0, 0, 24], sizes = [1, 8, 8], strides = [1, 1, 1]} : vector<1x8x32xbf16> to vector<1x8x8xbf16>
    "tpu.trace_start"() <{level = 10 : i32, message = "bqd,bkd->bqk"}> : () -> ()
    %cst_42 = arith.constant dense<0.000000e+00> : vector<1x8x8xf32>
    %113 = tpu.matmul %110, %111, %cst_42 {dimension_numbers = #tpu.dot_dimension_numbers<[2], [2], [1], [1], [0, 0, 0, 1, 1, 1], [0], [0]>} : vector<1x8x8xbf16>, vector<1x8x8xbf16>, vector<1x8x8xf32> -> vector<1x8x8xf32>
    %cst_43 = arith.constant 0xFF800000 : f32
    "tpu.trace_stop"() : () -> ()
    %114 = vector.broadcast %cst_43 : f32 to vector<1x8x8xf32>
    %115 = arith.select %49, %113, %114 : vector<1x8x8xi1>, vector<1x8x8xf32>
    %cst_44 = arith.constant dense<0xFF800000> : vector<1x8xf32>
    %116 = vector.multi_reduction <maximumf>, %115, %cst_44 [2] : vector<1x8x8xf32> to vector<1x8xf32>
    %117 = vector.shape_cast %116 : vector<1x8xf32> to vector<1x8x1xf32>
    %118 = vector.broadcast %117 : vector<1x8x1xf32> to vector<1x8x8xf32>
    %119 = arith.subf %115, %118 : vector<1x8x8xf32>
    %120 = math.exp %119 : vector<1x8x8xf32>
    %cst_45 = arith.constant dense<0.000000e+00> : vector<1x8xf32>
    %121 = vector.multi_reduction <add>, %120, %cst_45 [2] : vector<1x8x8xf32> to vector<1x8xf32>
    %122 = vector.shape_cast %121 : vector<1x8xf32> to vector<1x8x1xf32>
    %123 = tpu.reciprocal %122 {approx = true} : vector<1x8x1xf32> -> vector<1x8x1xf32>
    %124 = vector.broadcast %123 : vector<1x8x1xf32> to vector<1x8x8xf32>
    %125 = arith.mulf %120, %124 : vector<1x8x8xf32>
    %126 = arith.truncf %125 : vector<1x8x8xf32> to vector<1x8x8xbf16>
    "tpu.trace_start"() <{level = 10 : i32, message = "bqk,bkd->bqd"}> : () -> ()
    %cst_46 = arith.constant dense<0.000000e+00> : vector<1x8x8xf32>
    %127 = tpu.matmul %126, %112, %cst_46 {dimension_numbers = #tpu.dot_dimension_numbers<[2], [1], [1], [2], [0, 0, 0, 1, 1, 2], [0], [0]>} : vector<1x8x8xbf16>, vector<1x8x8xbf16>, vector<1x8x8xf32> -> vector<1x8x8xf32>
    "tpu.trace_stop"() : () -> ()
    %128 = arith.truncf %127 : vector<1x8x8xf32> to vector<1x8x8xbf16>
    %c0_47 = arith.constant 0 : index
    %c0_48 = arith.constant 0 : index
    %c24 = arith.constant 24 : index
    %129 = vector.load %arg18[%c0_47, %c0_48, %c24] : memref<1x8x32xbf16, #tpu.memory_space<vmem>>, vector<1x8x8xbf16>
    tpu.vector_store %arg18[%c0_47, %c0_48, %c24], %128 {strides = array<i32>} : memref<1x8x32xbf16, #tpu.memory_space<vmem>>, vector<1x8x8xbf16>,
    %c0_49 = arith.constant 0 : index
    %c0_50 = arith.constant 0 : index
    %c0_51 = arith.constant 0 : index
    %130 = vector.load %arg18[%c0_49, %c0_50, %c0_51] : memref<1x8x32xbf16, #tpu.memory_space<vmem>>, vector<1x8x32xbf16>
    %131 = vector.shape_cast %130 : vector<1x8x32xbf16> to vector<8x32xbf16>
    %c0_52 = arith.constant 0 : index
    %c0_53 = arith.constant 0 : index
    %c0_54 = arith.constant 0 : index
    %132 = vector.load %arg8[%c0_52, %c0_53, %c0_54] : memref<1x32x32xbf16, #tpu.memory_space<vmem>>, vector<1x32x32xbf16>
    %133 = vector.shape_cast %132 : vector<1x32x32xbf16> to vector<32x32xbf16>
    %cst_55 = arith.constant dense<0.000000e+00> : vector<8x32xf32>
    %134 = tpu.matmul %131, %133, %cst_55 {dimension_numbers = #tpu.dot_dimension_numbers<[1], [0], [0], [1], [0, 0, 1, 1], [], []>} : vector<8x32xbf16>, vector<32x32xbf16>, vector<8x32xf32> -> vector<8x32xf32>
    %c0_56 = arith.constant 0 : index
    %c0_57 = arith.constant 0 : index
    %c0_58 = arith.constant 0 : index
    %135 = vector.load %arg9[%c0_56, %c0_57, %c0_58] : memref<1x1x32xf32, #tpu.memory_space<vmem>>, vector<1x1x32xf32>
    %136 = vector.shape_cast %135 : vector<1x1x32xf32> to vector<1x32xf32>
    %137 = vector.broadcast %136 : vector<1x32xf32> to vector<8x32xf32>
    %138 = arith.addf %134, %137 : vector<8x32xf32>
    %139 = vector.shape_cast %138 : vector<8x32xf32> to vector<1x8x32xf32>
    %140 = arith.addf %3, %139 : vector<1x8x32xf32>
    %c0_59 = arith.constant 0 : index
    %c0_60 = arith.constant 0 : index
    %c0_61 = arith.constant 0 : index
    %141 = vector.load %arg10[%c0_59, %c0_60, %c0_61] : memref<1x1x32xf32, #tpu.memory_space<vmem>>, vector<1x1x32xf32>
    %142 = vector.shape_cast %141 : vector<1x1x32xf32> to vector<1x32xf32>
    %c0_62 = arith.constant 0 : index
    %c0_63 = arith.constant 0 : index
    %c0_64 = arith.constant 0 : index
    %143 = vector.load %arg11[%c0_62, %c0_63, %c0_64] : memref<1x1x32xf32, #tpu.memory_space<vmem>>, vector<1x1x32xf32>
    %144 = vector.shape_cast %143 : vector<1x1x32xf32> to vector<1x32xf32>
    %cst_65 = arith.constant dense<0.000000e+00> : vector<1x8xf32>
    %145 = vector.multi_reduction <add>, %140, %cst_65 [2] : vector<1x8x32xf32> to vector<1x8xf32>
    %146 = vector.shape_cast %145 : vector<1x8xf32> to vector<1x8x1xf32>
    %cst_66 = arith.constant 3.200000e+01 : f32
    %147 = vector.broadcast %cst_66 : f32 to vector<1x8x1xf32>
    %148 = arith.divf %146, %147 : vector<1x8x1xf32>
    %149 = vector.broadcast %148 : vector<1x8x1xf32> to vector<1x8x32xf32>
    %150 = arith.subf %140, %149 : vector<1x8x32xf32>
    %151 = arith.mulf %150, %150 : vector<1x8x32xf32>
    %cst_67 = arith.constant dense<0.000000e+00> : vector<1x8xf32>
    %152 = vector.multi_reduction <add>, %151, %cst_67 [2] : vector<1x8x32xf32> to vector<1x8xf32>
    %153 = vector.shape_cast %152 : vector<1x8xf32> to vector<1x8x1xf32>
    %cst_68 = arith.constant 3.200000e+01 : f32
    %154 = vector.broadcast %cst_68 : f32 to vector<1x8x1xf32>
    %155 = arith.divf %153, %154 : vector<1x8x1xf32>
    %156 = vector.broadcast %148 : vector<1x8x1xf32> to vector<1x8x32xf32>
    %157 = arith.subf %140, %156 : vector<1x8x32xf32>
    %cst_69 = arith.constant 9.99999974E-6 : f32
    %158 = vector.broadcast %cst_69 : f32 to vector<1x8x1xf32>
    %159 = arith.addf %155, %158 : vector<1x8x1xf32>
    %160 = math.rsqrt %159 : vector<1x8x1xf32>
    %161 = vector.broadcast %160 : vector<1x8x1xf32> to vector<1x8x32xf32>
    %162 = arith.mulf %157, %161 : vector<1x8x32xf32>
    %163 = vector.shape_cast %142 : vector<1x32xf32> to vector<1x1x32xf32>
    %164 = vector.broadcast %163 : vector<1x1x32xf32> to vector<1x8x32xf32>
    %165 = arith.mulf %162, %164 : vector<1x8x32xf32>
    %166 = vector.shape_cast %144 : vector<1x32xf32> to vector<1x1x32xf32>
    %167 = vector.broadcast %166 : vector<1x1x32xf32> to vector<1x8x32xf32>
    %168 = arith.addf %165, %167 : vector<1x8x32xf32>
    %169 = vector.shape_cast %168 : vector<1x8x32xf32> to vector<8x32xf32>
    %170 = arith.truncf %169 : vector<8x32xf32> to vector<8x32xbf16>
    %c0_70 = arith.constant 0 : index
    %c0_71 = arith.constant 0 : index
    %c0_72 = arith.constant 0 : index
    %171 = vector.load %arg12[%c0_70, %c0_71, %c0_72] : memref<1x32x128xbf16, #tpu.memory_space<vmem>>, vector<1x32x128xbf16>
    %172 = vector.shape_cast %171 : vector<1x32x128xbf16> to vector<32x128xbf16>
    %cst_73 = arith.constant dense<0.000000e+00> : vector<8x128xf32>
    %173 = tpu.matmul %170, %172, %cst_73 {dimension_numbers = #tpu.dot_dimension_numbers<[1], [0], [0], [1], [0, 0, 1, 1], [], []>} : vector<8x32xbf16>, vector<32x128xbf16>, vector<8x128xf32> -> vector<8x128xf32>
    %c0_74 = arith.constant 0 : index
    %c0_75 = arith.constant 0 : index
    %c0_76 = arith.constant 0 : index
    %174 = vector.load %arg13[%c0_74, %c0_75, %c0_76] : memref<1x1x128xf32, #tpu.memory_space<vmem>>, vector<1x1x128xf32>
    %175 = vector.shape_cast %174 : vector<1x1x128xf32> to vector<1x128xf32>
    %176 = vector.broadcast %175 : vector<1x128xf32> to vector<8x128xf32>
    %177 = arith.addf %173, %176 : vector<8x128xf32>
    %cst_77 = arith.constant 1.702000e+00 : f32
    %178 = vector.broadcast %cst_77 : f32 to vector<8x128xf32>
    %179 = arith.mulf %178, %177 : vector<8x128xf32>
    %180 = arith.negf %179 : vector<8x128xf32>
    %181 = math.exp %180 : vector<8x128xf32>
    %cst_78 = arith.constant 1.000000e+00 : f32
    %182 = vector.broadcast %cst_78 : f32 to vector<8x128xf32>
    %183 = arith.addf %182, %181 : vector<8x128xf32>
    %184 = arith.divf %182, %183 : vector<8x128xf32>
    %185 = arith.mulf %177, %184 : vector<8x128xf32>
    %186 = arith.truncf %185 : vector<8x128xf32> to vector<8x128xbf16>
    %c0_79 = arith.constant 0 : index
    %c0_80 = arith.constant 0 : index
    %c0_81 = arith.constant 0 : index
    %187 = vector.load %arg14[%c0_79, %c0_80, %c0_81] : memref<1x128x32xbf16, #tpu.memory_space<vmem>>, vector<1x128x32xbf16>
    %188 = vector.shape_cast %187 : vector<1x128x32xbf16> to vector<128x32xbf16>
    %cst_82 = arith.constant dense<0.000000e+00> : vector<8x32xf32>
    %189 = tpu.matmul %186, %188, %cst_82 {dimension_numbers = #tpu.dot_dimension_numbers<[1], [0], [0], [1], [0, 0, 1, 1], [], []>} : vector<8x128xbf16>, vector<128x32xbf16>, vector<8x32xf32> -> vector<8x32xf32>
    %c0_83 = arith.constant 0 : index
    %c0_84 = arith.constant 0 : index
    %c0_85 = arith.constant 0 : index
    %190 = vector.load %arg15[%c0_83, %c0_84, %c0_85] : memref<1x1x32xf32, #tpu.memory_space<vmem>>, vector<1x1x32xf32>
    %191 = vector.shape_cast %190 : vector<1x1x32xf32> to vector<1x32xf32>
    %192 = vector.broadcast %191 : vector<1x32xf32> to vector<8x32xf32>
    %193 = arith.addf %189, %192 : vector<8x32xf32>
    %194 = vector.shape_cast %193 : vector<8x32xf32> to vector<1x8x32xf32>
    %195 = arith.addf %140, %194 : vector<1x8x32xf32>
    %c0_86 = arith.constant 0 : index
    %c0_87 = arith.constant 0 : index
    %c0_88 = arith.constant 0 : index
    %196 = vector.load %arg17[%c0_86, %c0_87, %c0_88] : memref<1x8x32xf32, #tpu.memory_space<vmem>>, vector<1x8x32xf32>
    tpu.vector_store %arg17[%c0_86, %c0_87, %c0_88], %195 {strides = array<i32>} : memref<1x8x32xf32, #tpu.memory_space<vmem>>, vector<1x8x32xf32>,
    %c1_i32 = arith.constant 1 : i32
    %197 = arith.cmpi eq, %arg1, %c1_i32 : i32
    %198 = arith.extui %197 : i1 to i32
    %c0_i32_89 = arith.constant 0 : i32
    %199 = arith.cmpi ne, %198, %c0_i32_89 : i32
    scf.if %199 {
      %c0_90 = arith.constant 0 : index
      %c0_91 = arith.constant 0 : index
      %c0_92 = arith.constant 0 : index
      %200 = vector.load %arg16[%c0_90, %c0_91, %c0_92] : memref<1x8x32xf32, #tpu.memory_space<vmem>>, vector<1x8x32xf32>
      tpu.vector_store %arg16[%c0_90, %c0_91, %c0_92], %195 {strides = array<i32>} : memref<1x8x32xf32, #tpu.memory_space<vmem>>, vector<1x8x32xf32>,
    } else {
    }
    return
  }
  func.func @transform_0(%arg0: i32, %arg1: i32) -> (i32, i32, i32) {
    %c0_i32 = arith.constant 0 : i32
    %c0_i32_0 = arith.constant 0 : i32
    %c0_i32_1 = arith.constant 0 : i32
    return %arg0, %c0_i32, %c0_i32_0 : i32, i32, i32
  }
  func.func @transform_1(%arg0: i32, %arg1: i32) -> (i32, i32) {
    %c0_i32 = arith.constant 0 : i32
    %c0_i32_0 = arith.constant 0 : i32
    %c0_i32_1 = arith.constant 0 : i32
    return %c0_i32, %c0_i32_0 : i32, i32
  }
  func.func @transform_2(%arg0: i32, %arg1: i32) -> (i32, i32, i32) {
    %c0_i32 = arith.constant 0 : i32
    %c0_i32_0 = arith.constant 0 : i32
    %c0_i32_1 = arith.constant 0 : i32
    return %arg1, %c0_i32, %c0_i32_0 : i32, i32, i32
  }
  func.func @transform_3(%arg0: i32, %arg1: i32) -> (i32, i32, i32) {
    %c0_i32 = arith.constant 0 : i32
    %c0_i32_0 = arith.constant 0 : i32
    %c0_i32_1 = arith.constant 0 : i32
    return %arg1, %c0_i32, %c0_i32_0 : i32, i32, i32
  }
  func.func @transform_4(%arg0: i32, %arg1: i32) -> (i32, i32, i32) {
    %c0_i32 = arith.constant 0 : i32
    %c0_i32_0 = arith.constant 0 : i32
    %c0_i32_1 = arith.constant 0 : i32
    return %arg1, %c0_i32, %c0_i32_0 : i32, i32, i32
  }
  func.func @transform_5(%arg0: i32, %arg1: i32) -> (i32, i32, i32) {
    %c0_i32 = arith.constant 0 : i32
    %c0_i32_0 = arith.constant 0 : i32
    %c0_i32_1 = arith.constant 0 : i32
    return %arg1, %c0_i32, %c0_i32_0 : i32, i32, i32
  }
  func.func @transform_6(%arg0: i32, %arg1: i32) -> (i32, i32, i32) {
    %c0_i32 = arith.constant 0 : i32
    %c0_i32_0 = arith.constant 0 : i32
    %c0_i32_1 = arith.constant 0 : i32
    return %arg1, %c0_i32, %c0_i32_0 : i32, i32, i32
  }
  func.func @transform_7(%arg0: i32, %arg1: i32) -> (i32, i32, i32) {
    %c0_i32 = arith.constant 0 : i32
    %c0_i32_0 = arith.constant 0 : i32
    %c0_i32_1 = arith.constant 0 : i32
    return %arg1, %c0_i32, %c0_i32_0 : i32, i32, i32
  }
  func.func @transform_8(%arg0: i32, %arg1: i32) -> (i32, i32, i32) {
    %c0_i32 = arith.constant 0 : i32
    %c0_i32_0 = arith.constant 0 : i32
    %c0_i32_1 = arith.constant 0 : i32
    return %arg1, %c0_i32, %c0_i32_0 : i32, i32, i32
  }
  func.func @transform_9(%arg0: i32, %arg1: i32) -> (i32, i32, i32) {
    %c0_i32 = arith.constant 0 : i32
    %c0_i32_0 = arith.constant 0 : i32
    %c0_i32_1 = arith.constant 0 : i32
    return %arg1, %c0_i32, %c0_i32_0 : i32, i32, i32
  }
  func.func @transform_10(%arg0: i32, %arg1: i32) -> (i32, i32, i32) {
    %c0_i32 = arith.constant 0 : i32
    %c0_i32_0 = arith.constant 0 : i32
    %c0_i32_1 = arith.constant 0 : i32
    return %arg1, %c0_i32, %c0_i32_0 : i32, i32, i32
  }
  func.func @transform_11(%arg0: i32, %arg1: i32) -> (i32, i32, i32) {
    %c0_i32 = arith.constant 0 : i32
    %c0_i32_0 = arith.constant 0 : i32
    %c0_i32_1 = arith.constant 0 : i32
    return %arg1, %c0_i32, %c0_i32_0 : i32, i32, i32
  }
  func.func @transform_12(%arg0: i32, %arg1: i32) -> (i32, i32, i32) {
    %c0_i32 = arith.constant 0 : i32
    %c0_i32_0 = arith.constant 0 : i32
    %c0_i32_1 = arith.constant 0 : i32
    return %arg1, %c0_i32, %c0_i32_0 : i32, i32, i32
  }
  func.func @transform_13(%arg0: i32, %arg1: i32) -> (i32, i32, i32) {
    %c0_i32 = arith.constant 0 : i32
    %c0_i32_0 = arith.constant 0 : i32
    %c0_i32_1 = arith.constant 0 : i32
    return %arg1, %c0_i32, %c0_i32_0 : i32, i32, i32
  }
  func.func @transform_14(%arg0: i32, %arg1: i32) -> (i32, i32, i32) {
    %c0_i32 = arith.constant 0 : i32
    %c0_i32_0 = arith.constant 0 : i32
    %c0_i32_1 = arith.constant 0 : i32
    return %arg0, %c0_i32, %c0_i32_0 : i32, i32, i32
  }
}

</mosaic_0001>

<bundles_post_ra>
// kernel: tpu_custom_call.1
= control target key start
LH: loop header
LB: loop body
LE: loop exit
PB: predicated region body
PF: predicated region fallthrough
CT: control target
= control target key end

     0   :  { %s2163_s0 = inlined_call_operand.vmem [shape: f32[2,8,32], index: 0, kind: input, shape index: {}]   ;;  %s2164_s1 = inlined_call_operand.vmem [shape: f32[8,32], index: 1, kind: input, shape index: {}]   ;;  %s2165_s2 = inlined_call_operand.vmem [shape: f32[2,1,32], index: 2, kind: input, shape index: {}]   ;;  %s2166_s3 = inlined_call_operand.vmem [shape: f32[2,1,32], index: 3, kind: input, shape index: {}]   ;;  %s2167_s4 = inlined_call_operand.vmem [shape: bf16[2,32,96], index: 4, kind: input, shape index: {}]   ;;  %s2168_s5 = inlined_call_operand.vmem [shape: f32[2,1,96], index: 5, kind: input, shape index: {}]   ;;  %s2169_s6 = inlined_call_operand.vmem [shape: bf16[2,32,32], index: 6, kind: input, shape index: {}]   ;;  %s2170_s7 = inlined_call_operand.vmem [shape: f32[2,1,32], index: 7, kind: input, shape index: {}]   ;;  %s2171_s8 = inlined_call_operand.vmem [shape: f32[2,1,32], index: 8, kind: input, shape index: {}]   ;;  %s2172_s9 = inlined_call_operand.vmem [shape: f32[2,1,32], index: 9, kind: input, shape index: {}]   ;;  %s2173_s10 = inlined_call_operand.vmem [shape: bf16[2,32,128], index: 10, kind: input, shape index: {}]   ;;  %s2174_s11 = inlined_call_operand.vmem [shape: f32[2,1,128], index: 11, kind: input, shape index: {}]   ;;  %s2175_s12 = inlined_call_operand.vmem [shape: bf16[2,128,32], index: 12, kind: input, shape index: {}]   ;;  %s2176_s13 = inlined_call_operand.vmem [shape: f32[2,1,32], index: 13, kind: input, shape index: {}]   ;;  %s2177_s14 = inlined_call_operand.hbm [shape: f32[2,8,32], index: 14, kind: output, shape index: {}]  }
   0x1   :  { %2193 = sst [smem:[#allocation20_spill]] %s2163_s0 }
   0x2   :  { %2194 = sst [smem:[#allocation21_spill]] %s2164_s1 }
   0x3   :  { %2195 = sst [smem:[#allocation22_spill]] %s2166_s3 }
   0x4   :  { %2196 = sst [smem:[#allocation23_spill]] %s2167_s4 }
   0x5   :  { %2197 = sst [smem:[#allocation24_spill]] %s2169_s6 }
   0x6   :  { %2198 = sst [smem:[#allocation25_spill]] %s2177_s14 }
   0x7   :  { %19 = vsyncpa [#allocation5], 0 }
   0x8   :  { %21 = vsyncpa [#allocation5 + $0x1], 0  ;;  %s1852_s29 = smov 0   ;;  %s1854_s30 = smov 0  }
   0x9   :  { %s1856_s15 = smov 0   ;;  %s1858_s16 = smov 0  }
   0xa   :  { %s1860_s17 = smov 0   ;;  %s1862_s18 = smov 0  }
   0xb   :  { %s1864_s19 = smov 0   ;;  %s1866_s20 = smov 0  }
   0xc LB: > { %2199 = sst [smem:[#allocation7_spill]] %s1732_s29  ;;  %s1439_s21 = sadd.s32 4294967295, %s1760_s20   ;;  %s1760_s20 = sphi %s1866_s20, %s27_s20   ;;  %s1756_s19 = sphi %s1864_s19, %s2241_s19   ;;  %s1752_s18 = sphi %s1862_s18, %s2240_s18   ;;  %s1748_s17 = sphi %s1860_s17, %s2239_s17   ;;  %s1744_s16 = sphi %s1858_s16, %s2238_s16   ;;  %s1740_s15 = sphi %s1856_s15, %s2237_s15   ;;  %s1736_s30 = sphi %s1854_s30, %s2236_s30   ;;  %s1732_s29 = sphi %s1852_s29, %s2235_s29  }
   0xd   : > { %2200 = sst [smem:[#allocation8_spill]] %s1736_s30  ;;  %s1440_s22 = sadd.s32 4294967294, %s1760_s20  }
   0xe   : > { %2201 = sst [smem:[#allocation9_spill]] %s1740_s15  ;;  %s36_s23 = sadd.s32 1, %s1752_s18 }
   0xf   : > { %2202 = sst [smem:[#allocation10_spill]] %s1744_s16  ;;  %p37_p0 = scmp.ge.s32.totalorder %s36_s23, 2 }
  0x10   : > { %2203 = sst [smem:[#allocation11_spill]] %s1748_s17  ;;  %s39_s24 = sadd.s32 1, %s1756_s19 }
  0x11   : > { %2204 = sst [smem:[#allocation12_spill]] %s1752_s18  ;;  %p415_p1 = scmp.ne.s32.totalorder %s1740_s15, %s1736_s30 }
  0x12   : > { %2205 = sst [smem:[#allocation13_spill]] %s1756_s19  ;;  %p416_p2 = scmp.eq.s32.totalorder %s1439_s21, 3 }
  0x13   : > { %2206 = sst [smem:[#allocation14_spill]] %s1760_s20  ;;  %s2243_s23 = smov (%p37_p0, %s36_s23), 0 }
  0x14   : > { %2207 = sst [smem:[#allocation15_spill]] %s2243_s23  ;;  %s2245_s24 = smov (!%p37_p0, %s39_s24), %s1756_s19 }
  0x15   : > { %p1901_p3 = por %p416_p2, %p415_p1  ;;  %p421_p4 = scmp.ne.s32.totalorder %s1736_s30, %s1732_s29 }
  0x16   : > { %p41_p5 = scmp.ge.s32.totalorder %s2245_s24, 2  ;;  %p422_p6 = scmp.eq.s32.totalorder %s1440_s22, 3 }
  0x17   : > { %s2208_s25 = scalar_select %p1901_p3, 1, 0 }
  0x18   : > { %p1443_p7 = scmp.ge.s32.totalorder %s1760_s20, 1  ;;  %p530_p8 = scmp.lt.s32.totalorder %s1760_s20, 5 }
  0x19   : > { %2209 = sst [smem:[#allocation16_spill]] %s2208_s25  ;;  %s2247_s24 = smov (%p41_p5, %s2245_s24), 0 }
  0x1a   : > { %2210 = sst [smem:[#allocation17_spill]] %s2247_s24  ;;  %p1911_p9 = por %p422_p6, %p421_p4 }
  0x1b   : > { %p531_p10 = pnand %p1443_p7, %p530_p8  ;;  %s402_s27 = ssub.s32 %s1756_s19, %s2247_s24 }
  0x1c   : > { %s2211_s26 = scalar_select %p1911_p9, 1, 0 }
  0x1d   : > { %s405_s28 = sadd.s32 1, %s1740_s15  ;;  %p403_p11 = scmp.eq.s32.totalorder %s402_s27, 0 }
  0x1e   : > { %2212 = sst [smem:[#allocation18_spill]] %s2211_s26  ;;  %534 = sbr.rel (%p531_p10) target bundleno = 2407 (0x967), region = 76 }
  0x1f   : > { %s1919_s21 = scalar_select %p403_p11, %s1740_s15, %s405_s28  }
  0x20   : > { %s2181_s22 = sand.u32 (!%p531_p10), 1, %s1736_s30   ;;  %p619_p12 = scmp.lt.s32.totalorder (!%p531_p10), %s1748_s17, 1 }
  0x21   : > { %2213 = sst [smem:[#allocation19_spill]] %s1919_s21  ;;  %s1925_s23 = sshll.u32 (!%p531_p10), %s2181_s22, 3 }
  0x22   : > { %p623_p13 = scmp.lt.s32.totalorder (!%p531_p10), %s1744_s16, 1  ;;  %s2214_s0 = sld [smem:[#allocation20_spill]] (!%p531_p10) }
  0x23   : > { %s620_s18 = scalar_select %p619_p12, %s1748_s17, 1 }
  0x24   : > { %s1930_s26 = scalar_select %p623_p13, %s1744_s16, 1 }
  0x25   : > { %s1445_s27 = sshll.u32 %s620_s18, 3  ;;  %s2216_s4 = sld [smem:[#allocation23_spill]] }
  0x26   : > { %s1528_s25 = sshll.u32 %s1930_s26, 4  ;;  %s2217_s6 = sld [smem:[#allocation24_spill]] }
  0x27   : > { %s1973_s18 = scalar_lea.vmem %s2173_s10, %s1528_s25  ;;  %s658_s24 = scalar_lea.vmem %s2174_s11, %s1930_s26 }
  0x28   : > { %s622_s22 = scalar_lea.vmem %s2214_s0, %s1445_s27  ;;  %s666_s29 = scalar_lea.vmem %s2176_s13, %s1930_s26 }
  0x29   : > { %s618_s30 = scalar_lea.vmem [#allocation4], %s1925_s23  ;;  %s2218_s17 = sld [smem:[#allocation10_spill]] }
  0x2b   : > { %s1947_s1 = scalar_lea.vmem %s2216_s4, %s1528_s25  ;;  %s650_s4 = scalar_lea.vmem %s2172_s9, %s1930_s26 }
  0x2c   : > { %s1956_s0 = scalar_lea.vmem %s2217_s6, %s1528_s25  ;;  %s1531_s6 = sshll.u32 %s1930_s26, 6 }
  0x2d   : > { %s1987_s15 = scalar_lea.vmem %s2175_s12, %s1531_s6 }
  0x2f   : > { %p1454_p0 = scmp.ne.s32.totalorder %s2218_s17, 0 }
  0x30   : > { %s2219_s16 = sld [smem:[#allocation21_spill]] (!%p1454_p0) }
  0x31   : > { %671 = sbr.rel (%p1454_p0) target bundleno = 59 (0x3b), region = 80 }
  0x36   : > { %v672_v0 = vld [vmem:[%s622_s22] sm:$0xff]  ;;  %vm675_vm0 = vcmask 261120  }
  0x37   : > { %v673_v1 = vld [vmem:[%s2219_s16] sm:$0xff] }
  0x38   : > { %v674_v2 = vadd.f32 %v673_v1, %v672_v0 }
  0x3a   : > { %676 = vst.msk [vmem:[#allocation2] sm:$0xff] %vm675_vm0, %v674_v2 }
  0x3b PF: > { %vm680_vm1 = vcmask 261120   ;;  %v1762_v5 = vmov 32.0   ;;  %v1533_v17 = vld [vmem:[%s1947_s1 + $0x8] sm:$0xff]  ;;  %v1532_v18 = vld [vmem:[%s1947_s1] sm:$0xff]  ;;  %s2220_s1 = scalar_lea.vmem %s2165_s2, %s1930_s26  ;;  %s2221_s19 = sld [smem:[#allocation22_spill]]  ;;  %vm804_vm6 = vcmask 1043456   ;;  %v756_v52 = vlaneseq }
  0x3c   : > { %1640 = vrcp.f32 %v1762_v5  ;;  %748 = vmatpush.bf16.msra.mxu0 %v1533_v17  ;;  %v1632_v28 = vld [vmem:[%s2220_s1] ss:$0 sm:$0xff]  ;;  %s2223_s17 = scalar_lea.vmem %s2168_s5, %s1930_s26  ;;  %s1763_s3 = smov 88   ;;  %vm766_vm7 = vcmask 64512   ;;  %vm822_vm9 = vcmask 60416   ;;  %vm886_vm10 = vcmask 126016  }
  0x3d   : > { %v1634_v35 = vld [vmem:[%s2223_s17] ss:$0 sm:$0xff]  ;;  %s1764_s25 = smov 64   ;;  %s1765_s16 = smov 96   ;;  %v757_v53 = vshrl.u32 %v756_v52, 7  ;;  %v759_v54 = vand.u32 127, %v756_v52 }
  0x3e   : > { %s1766_s6 = smov 72   ;;  %s1767_s22 = smov 80   ;;  %vm950_vm11 = vcmask 191616   ;;  %vm1014_vm12 = vcmask 257216  }
  0x3f   : > { %vm760_vm8 = vcmp.le.s32.totalorder %v759_v54, %v757_v53  ;;  %s1768_s1 = smov 120   ;;  %s1769_s28 = smov 104  }
  0x40   : > { %749 = vmatpush.bf16.msra.mxu0 %v1532_v18  ;;  %s1770_s27 = smov 112   ;;  %s1773_s14 = smov 56  }
  0x41   : > { %v1994_v3 = vld [vmem:[#allocation2] sm:$0xff]  ;;  %s2222_s21 = scalar_lea.vmem %s2221_s19, %s1930_s26  ;;  %s1771_s19 = smov 40  }
  0x42   : > { %v681_v4 = vsel %vm680_vm1, %v1994_v3, 0.0  ;;  %v1641_v6 = vpop.eup %1640  ;;  %v1633_v31 = vld [vmem:[%s2222_s21] ss:$0 sm:$0xff]  ;;  %s1772_s21 = smov 48   ;;  %s1774_s20 = smov 16  }
  0x43   : > { %682 = vadd.xlane.f32.xlu0 %v681_v4  ;;  %v685_v7 = vmul.f32 32.0, %v1641_v6  ;;  %vm689_vm2 = vweird.f32 %v1641_v6  ;;  %s1775_s17 = smov 8  }
  0x45   : > { %v686_v8 = vsub.f32 1.0, %v685_v7 }
  0x47   : > { %v687_v9 = vmul.f32 %v1641_v6, %v686_v8 }
  0x49   : > { %v688_v10 = vadd.f32 %v1641_v6, %v687_v9 }
  0x4b   : > { %v1998_v11 = vsel %vm689_vm2, %v1641_v6, %v688_v10 }
  0xb6   : > { %v683_v12 = vpop.xlane.xlu0 %682 }
  0xb7   : > { %v691_v13 = vmul.f32 %v1998_v11, %v683_v12 }
  0xb9   : > { %v692_v14 = vsub.f32 %v1994_v3, %v691_v13 }
  0xbb   : > { %v693_v15 = vmul.f32 %v692_v14, %v692_v14 }
  0xbd   : > { %v694_v16 = vsel %vm680_vm1, %v693_v15, 0.0 }
  0xbe   : > { %695 = vadd.xlane.f32.xlu0 %v694_v16 }
 0x131   : > { %v696_v19 = vpop.xlane.xlu0 %695 }
 0x132   : > { %v697_v20 = vmul.f32 %v696_v19, %v1998_v11 }
 0x134   : > { %v698_v21 = vadd.f32 1e-05, %v697_v20 }
 0x136   : > { %1642 = vrsqrt.f32 %v698_v21  ;;  %vm705_vm4 = vweird.f32 %v698_v21 }
 0x13c   : > { %v1643_v22 = vpop.eup %1642 }
 0x13d   : > { %v700_v23 = vmul.f32 %v1643_v22, %v698_v21  ;;  %vm706_vm3 = vweird.f32 %v1643_v22 }
 0x13e   : > { %vm707_vm5 = vmor %vm705_vm4, %vm706_vm3 }
 0x13f   : > { %v701_v24 = vmul.f32 %v1643_v22, %v700_v23 }
 0x141   : > { %v702_v25 = vmul.f32 0.5, %v701_v24 }
 0x143   : > { %v703_v26 = vsub.f32 1.5, %v702_v25 }
 0x145   : > { %v704_v27 = vmul.f32 %v1643_v22, %v703_v26 }
 0x147   : > { %v708_v29 = vsel %vm707_vm5, %v1643_v22, %v704_v27 }
 0x148   : > { %v709_v30 = vmul.f32 %v708_v29, %v692_v14 }
 0x14a   : > { %v713_v32 = vmul.f32 %v1632_v28, %v709_v30 }
 0x14c   : > { %v717_v33 = vadd.f32 %v1633_v31, %v713_v32 }
 0x14e   : > { %v718_v34 = vpack.c.bf16 %v717_v33, %v717_v33 }
 0x150   : > { %1463 = vmatmul.msk.bf16.vlgmr.msra.gmra.mxu0 %vm680_vm1, %v718_v34 }
 0x1cd   : > { %v751_v36 = vpop.f32.mrf.mxu0 }
 0x1ce   : > { %v752_v37 = vadd.f32 %v1634_v35, %v751_v36 }
 0x1d0   : > { %v755_v38 = vpack.c.bf16 %v752_v37, %v752_v37 }
 0x1d2   : > { %v762_v39 = vunpack.c.l.b16 %v755_v38 }
 0x1d4   : > { %v2022_v40 = vpack.c.b16 %v762_v39, %v762_v39 }
 0x1d5   : > { %v753_v41 = vpop.f32.mrf.mxu0 }
 0x1d6   : > { %826 = vrot.lane.b32.xlu0 %v2022_v40, %s1763_s3  ;;  %799 = vrot.lane.b32.xlu2 %v2022_v40, %s1764_s25  ;;  %s1776_s3 = smov 24  }
 0x1d7   : > { %764 = vrot.lane.b32.xlu1 %v2022_v40, %s1765_s16 }
 0x1de   : > { %954 = vrot.lane.b32.xlu0 %v2022_v40, %s1766_s6  ;;  %s2224_s6 = scalar_lea.vmem %s2170_s7, %s1930_s26 }
 0x1e6   : > { %890 = vrot.lane.b32.xlu0 %v2022_v40, %s1767_s22  ;;  %s2225_s22 = scalar_lea.vmem %s2171_s8, %s1930_s26 }
 0x230   : > { %v800_v42 = vpop.permute.xlu2 %799 }
 0x231   : > { %v806_v43 = vsel %vm804_vm6, %v800_v42, 0 }
 0x232   : > { %815 = vmatpush.bf16.msra.mxu2 %v806_v43 }
 0x248   : > { %v827_v44 = vpop.permute.xlu0 %826 }
 0x249   : > { %v765_v45 = vpop.permute.xlu1 %764  ;;  %v832_v46 = vsel %vm766_vm7, %v827_v44, 0 }
 0x24a   : > { %v771_v47 = vsel %vm766_vm7, %v765_v45, 0  ;;  %841 = vmatpush.bf16.xpose.msrb.mxu2 %v832_v46 }
 0x24b   : > { %780 = vmatpush.bf16.xpose.msra.mxu1 %v771_v47 }
 0x250   : > { %v955_v48 = vpop.permute.xlu0 %954 }
 0x251   : > { %v960_v49 = vsel %vm766_vm7, %v955_v48, 0 }
 0x252   : > { %1464 = vmatmul.msk.bf16.vlgmr.msra.gmra.mxu1 %vm766_vm7, %v755_v38  ;;  %969 = vmatpush.bf16.xpose.msra.mxu3 %v960_v49 }
 0x258   : > { %v891_v50 = vpop.permute.xlu0 %890 }
 0x259   : > { %v896_v51 = vsel %vm766_vm7, %v891_v50, 0 }
 0x25a   : > { %905 = vmatpush.bf16.xpose.msrb.mxu0 %v896_v51 }
 0x2cf   : > { %v782_v55 = vpop.f32.mrf.mxu1 }
 0x2d0   : > { %v786_v56 = vsel %vm760_vm8, %v782_v55, -inf }
 0x2d1   : > { %v787_v57 = vsel %vm766_vm7, %v786_v56, -inf }
 0x2d2   : > { %788 = vmax.xlane.f32.xlu1 %v787_v57 }
 0x2d7   : > { %v784_v58 = vpop.f32.mrf.mxu1 }
 0x345   : > { %v789_v59 = vpop.xlane.xlu1 %788 }
 0x346   : > { %v790_v60 = vsub.f32 %v786_v56, %v789_v59 }
 0x348   : > { %v791_v61 = vmul.f32 1.442695, %v790_v60 }
 0x34a   : > { %1644 = vpow2.f32 %v791_v61 }
 0x350   : > { %v1645_v62 = vpop.eup %1644 }
 0x351   : > { %v793_v63 = vsel %vm766_vm7, %v1645_v62, 0.0 }
 0x352   : > { %794 = vadd.xlane.f32.xlu2 %v793_v63 }
 0x36a   : > { %824 = vrot.lane.b32.xlu2 %v2022_v40, %s1768_s1 }
 0x372   : > { %952 = vrot.lane.b32.xlu2 %v2022_v40, %s1769_s28 }
 0x37a   : > { %888 = vrot.lane.b32.xlu2 %v2022_v40, %s1770_s27 }
 0x3c5   : > { %v795_v0 = vpop.xlane.xlu2 %794 }
 0x3c6   : > { %1646 = vrcp.f32 %v795_v0 }
 0x3cc   : > { %v1647_v1 = vpop.eup %1646 }
 0x3cd   : > { %v825_v2 = vpop.permute.xlu2 %824  ;;  %v797_v4 = vmul.f32 %v1647_v1, %v1645_v62 }
 0x3cf   : > { %v798_v5 = vpack.c.bf16 %v797_v4, %v797_v4 }
 0x3d1   : > { %1465 = vmatmul.msk.bf16.vlgmr.msra.gmra.mxu2 %vm766_vm7, %v798_v5 }
 0x3d5   : > { %v953_v6 = vpop.permute.xlu2 %952 }
 0x3d6   : > { %1470 = vmatmul.msk.bf16.vlgmr.msra.gmra.mxu3 %vm766_vm7, %v953_v6  ;;  %v1534_v6 = vld [vmem:[%s1956_s0] sm:$0xff] }
 0x3dd   : > { %v889_v7 = vpop.permute.xlu2 %888 }
 0x3de   : > { %1468 = vmatmul.msk.bf16.vlgmr.msrb.gmra.mxu0 %vm766_vm7, %v889_v7 }
 0x3e1   : > { %1466 = vmatmul.msk.bf16.vlgmr.msrb.gmra.mxu2 %vm766_vm7, %v825_v2  ;;  %v1535_v2 = vld [vmem:[%s1956_s0 + $0x8] sm:$0xff] }
 0x3e2   : > { %1046 = vmatpush.bf16.msra.mxu0 %v1535_v2 }
 0x3e6   : > { %1047 = vmatpush.bf16.msra.mxu0 %v1534_v6 }
 0x454   : > { %v817_v8 = vpop.f32.mrf.mxu2 }
 0x455   : > { %v821_v9 = vpack.c.bf16 %v817_v8, %v817_v8 }
 0x457   : > { %823 = vst.msk [vmem:[#allocation3] sm:$0xf] %vm822_vm9, %v821_v9  ;;  %v1635_v9 = vld [vmem:[%s2224_s6] ss:$0 sm:$0xff] }
 0x459   : > { %v971_v10 = vpop.f32.mrf.mxu3 }
 0x45a   : > { %v975_v12 = vsel %vm760_vm8, %v971_v10, -inf }
 0x45b   : > { %v907_v13 = vpop.f32.mrf.mxu0  ;;  %v976_v14 = vsel %vm766_vm7, %v975_v12, -inf }
 0x45c   : > { %v911_v15 = vsel %vm760_vm8, %v907_v13, -inf  ;;  %v819_v16 = vpop.f32.mrf.mxu2  ;;  %977 = vmax.xlane.f32.xlu0 %v976_v14 }
 0x45d   : > { %v912_v17 = vsel %vm766_vm7, %v911_v15, -inf }
 0x45e   : > { %913 = vmax.xlane.f32.xlu2 %v912_v17 }
 0x461   : > { %v973_v18 = vpop.f32.mrf.mxu3 }
 0x463   : > { %v909_v19 = vpop.f32.mrf.mxu0 }
 0x464   : > { %v843_v20 = vpop.f32.mrf.mxu2 }
 0x465   : > { %v847_v21 = vsel %vm760_vm8, %v843_v20, -inf }
 0x466   : > { %v848_v22 = vsel %vm766_vm7, %v847_v21, -inf }
 0x467   : > { %849 = vmax.xlane.f32.xlu1 %v848_v22  ;;  %v1536_v22 = vld [vmem:[%s1973_s18] sm:$0xff] }
 0x46c   : > { %v845_v23 = vpop.f32.mrf.mxu2 }
 0x476   : > { %988 = vrot.lane.b32.xlu2 %v2022_v40, %s1771_s19  ;;  %s2226_s19 = sld [smem:[#allocation10_spill]] }
 0x47c   : > { %p1523_p1 = scmp.ne.s32.totalorder %s2226_s19, 1 }
 0x4cf   : > { %v978_v34 = vpop.xlane.xlu0 %977 }
 0x4d0   : > { %v979_v35 = vsub.f32 %v975_v12, %v978_v34 }
 0x4d1   : > { %v914_v24 = vpop.xlane.xlu2 %913 }
 0x4d2   : > { %v915_v25 = vsub.f32 %v911_v15, %v914_v24  ;;  %v980_v36 = vmul.f32 1.442695, %v979_v35 }
 0x4d4   : > { %v916_v26 = vmul.f32 1.442695, %v915_v25 }
 0x4d6   : > { %1648 = vpow2.f32 %v916_v26 }
 0x4d9   : > { %v989_v47 = vpop.permute.xlu2 %988 }
 0x4da   : > { %v850_v27 = vpop.xlane.xlu1 %849  ;;  %v994_v51 = vsel %vm804_vm6, %v989_v47, 0 }
 0x4db   : > { %v851_v28 = vsub.f32 %v847_v21, %v850_v27  ;;  %v1537_v21 = vld [vmem:[%s1973_s18 + $0x8] sm:$0xff] }
 0x4dc   : > { %v1649_v29 = vpop.eup %1648 }
 0x4dd   : > { %v852_v30 = vmul.f32 1.442695, %v851_v28  ;;  %v918_v31 = vsel %vm766_vm7, %v1649_v29, 0.0 }
 0x4de   : > { %919 = vadd.xlane.f32.xlu0 %v918_v31  ;;  %v1636_v31 = vld [vmem:[%s2225_s22] ss:$0 sm:$0xff] }
 0x4df   : > { %1650 = vpow2.f32 %v852_v30 }
 0x4e0   : > { %1652 = vpow2.f32 %v980_v36 }
 0x4e5   : > { %v1651_v32 = vpop.eup %1650 }
 0x4e6   : > { %v854_v33 = vsel %vm766_vm7, %v1651_v32, 0.0  ;;  %v1653_v37 = vpop.eup %1652 }
 0x4e7   : > { %855 = vadd.xlane.f32.xlu1 %v854_v33  ;;  %v982_v38 = vsel %vm766_vm7, %v1653_v37, 0.0  ;;  %v1637_v33 = vld [vmem:[%s650_s4] ss:$0 sm:$0xff] }
 0x4f2   : > { %924 = vrot.lane.b32.xlu0 %v2022_v40, %s1772_s21 }
 0x500   : > { %860 = vrot.lane.b32.xlu1 %v2022_v40, %s1773_s14 }
 0x52a   : > { %983 = vadd.xlane.f32.xlu1 %v982_v38  ;;  %v1544_v38 = vld [vmem:[%s1987_s15 + $0x30] sm:$0xff] }
 0x551   : > { %v920_v39 = vpop.xlane.xlu0 %919 }
 0x552   : > { %1654 = vrcp.f32 %v920_v39  ;;  %v1543_v39 = vld [vmem:[%s1987_s15 + $0x28] sm:$0xff] }
 0x558   : > { %v1655_v41 = vpop.eup %1654 }
 0x559   : > { %v922_v42 = vmul.f32 %v1655_v41, %v1649_v29  ;;  %v1542_v41 = vld [vmem:[%s1987_s15 + $0x20] sm:$0xff] }
 0x55a   : > { %v856_v44 = vpop.xlane.xlu1 %855 }
 0x55b   : > { %v923_v46 = vpack.c.bf16 %v922_v42, %v922_v42  ;;  %1656 = vrcp.f32 %v856_v44  ;;  %v1541_v42 = vld [vmem:[%s1987_s15 + $0x18] sm:$0xff]  ;;  %v1539_v44 = vld [vmem:[%s1987_s15 + $0x8] sm:$0xff] }
 0x561   : > { %v1657_v40 = vpop.eup %1656 }
 0x562   : > { %v858_v48 = vmul.f32 %v1657_v40, %v1651_v32  ;;  %v1538_v40 = vld [vmem:[%s1987_s15] sm:$0xff] }
 0x564   : > { %v925_v43 = vpop.permute.xlu0 %924  ;;  %v859_v52 = vpack.c.bf16 %v858_v48, %v858_v48 }
 0x565   : > { %v930_v45 = vsel %vm804_vm6, %v925_v43, 0  ;;  %v1540_v43 = vld [vmem:[%s1987_s15 + $0x10] sm:$0xff] }
 0x566   : > { %939 = vmatpush.bf16.msrb.mxu1 %v930_v45  ;;  %v1638_v45 = vld [vmem:[%s658_s24] ss:$0 sm:$0xff] }
 0x569   : > { %1469 = vmatmul.msk.bf16.vlgmr.msrb.gmra.mxu1 %vm766_vm7, %v923_v46 }
 0x56a   : > { %1116 = vmatpush.bf16.msra.mxu1 %v1537_v21 }
 0x56e   : > { %1117 = vmatpush.bf16.msra.mxu1 %v1536_v22 }
 0x572   : > { %v861_v49 = vpop.permute.xlu1 %860 }
 0x573   : > { %v866_v50 = vsel %vm804_vm6, %v861_v49, 0 }
 0x574   : > { %875 = vmatpush.bf16.msra.mxu2 %v866_v50 }
 0x577   : > { %1467 = vmatmul.msk.bf16.vlgmr.msra.gmra.mxu2 %vm766_vm7, %v859_v52 }
 0x578   : > { %1003 = vmatpush.bf16.msrb.mxu2 %v994_v51 }
 0x59d   : > { %v984_v53 = vpop.xlane.xlu1 %983 }
 0x59e   : > { %1658 = vrcp.f32 %v984_v53 }
 0x5a4   : > { %v1659_v54 = vpop.eup %1658 }
 0x5a5   : > { %v986_v55 = vmul.f32 %v1659_v54, %v1653_v37  ;;  %v1545_v37 = vld [vmem:[%s1987_s15 + $0x38] sm:$0xff] }
 0x5a6   : > { %1213 = vmatpush.bf16.msrb.mxu3 %v1545_v37 }
 0x5a7   : > { %v987_v56 = vpack.c.bf16 %v986_v55, %v986_v55 }
 0x5a9   : > { %1471 = vmatmul.msk.bf16.vlgmr.msrb.gmra.mxu2 %vm766_vm7, %v987_v56 }
 0x5aa   : > { %1214 = vmatpush.bf16.msrb.mxu3 %v1544_v38 }
 0x5ae   : > { %1215 = vmatpush.bf16.msrb.mxu3 %v1543_v39 }
 0x5b2   : > { %1216 = vmatpush.bf16.msrb.mxu3 %v1542_v41 }
 0x5b6   : > { %1217 = vmatpush.bf16.msrb.mxu3 %v1541_v42 }
 0x5ba   : > { %1218 = vmatpush.bf16.msrb.mxu3 %v1540_v43 }
 0x5be   : > { %1219 = vmatpush.bf16.msrb.mxu3 %v1539_v44 }
 0x5c2   : > { %1220 = vmatpush.bf16.msrb.mxu3 %v1538_v40 }
 0x5e6   : > { %v941_v57 = vpop.f32.mrf.mxu1 }
 0x5e7   : > { %v945_v58 = vpack.c.bf16 %v941_v57, %v941_v57 }
 0x5e9   : > { %947 = vrot.lane.b32.xlu0 %v945_v58, %s1774_s20 }
 0x5ee   : > { %v943_v59 = vpop.f32.mrf.mxu1 }
 0x5fa   : > { %v877_v60 = vpop.f32.mrf.mxu2 }
 0x5fb   : > { %v881_v61 = vpack.c.bf16 %v877_v60, %v877_v60 }
 0x5fd   : > { %883 = vrot.lane.b32.xlu2 %v881_v61, %s1775_s17 }
 0x602   : > { %v879_v62 = vpop.f32.mrf.mxu2 }
 0x62c   : > { %v1005_v63 = vpop.f32.mrf.mxu2 }
 0x62d   : > { %v1009_v0 = vpack.c.bf16 %v1005_v63, %v1005_v63 }
 0x62f   : > { %1011 = vrot.lane.b32.xlu2 %v1009_v0, %s1776_s3 }
 0x634   : > { %v1007_v1 = vpop.f32.mrf.mxu2 }
 0x635   : > { %v1639_v1 = vld [vmem:[%s666_s29] ss:$0 sm:$0xff] }
 0x657   : > { %v884_v4 = vpop.permute.xlu2 %883 }
 0x658   : > { %887 = vst.msk [vmem:[#allocation3] sm:$0xf] %vm886_vm10, %v884_v4 }
 0x65b   : > { %v948_v5 = vpop.permute.xlu0 %947 }
 0x65c   : > { %951 = vst.msk [vmem:[#allocation3] sm:$0xf] %vm950_vm11, %v948_v5 }
 0x689   : > { %v1012_v7 = vpop.permute.xlu2 %1011 }
 0x68a   : > { %1015 = vst.msk [vmem:[#allocation3] sm:$0xf] %vm1014_vm12, %v1012_v7 }
 0x691   : > { %v1016_v8 = vld [vmem:[#allocation3] sm:$0xf] }
 0x692   : > { %1480 = vmatmul.msk.bf16.vlgmr.msra.gmra.mxu0 %vm680_vm1, %v1016_v8 }
 0x70f   : > { %v1049_v10 = vpop.f32.mrf.mxu0 }
 0x710   : > { %v1050_v12 = vadd.f32 %v1635_v9, %v1049_v10 }
 0x712   : > { %v2072_v13 = vadd.f32 %v1050_v12, %v1994_v3 }
 0x714   : > { %v1056_v14 = vsel %vm680_vm1, %v2072_v13, 0.0 }
 0x715   : > { %1057 = vadd.xlane.f32.xlu0 %v1056_v14 }
 0x717   : > { %v1051_v15 = vpop.f32.mrf.mxu0 }
 0x788   : > { %v1058_v16 = vpop.xlane.xlu0 %1057 }
 0x789   : > { %v1059_v17 = vmul.f32 %v1058_v16, %v1998_v11 }
 0x78b   : > { %v1060_v18 = vsub.f32 %v2072_v13, %v1059_v17 }
 0x78d   : > { %v1061_v19 = vmul.f32 %v1060_v18, %v1060_v18 }
 0x78f   : > { %v1062_v20 = vsel %vm680_vm1, %v1061_v19, 0.0 }
 0x790   : > { %1063 = vadd.xlane.f32.xlu1 %v1062_v20 }
 0x803   : > { %v1064_v3 = vpop.xlane.xlu1 %1063 }
 0x804   : > { %v1065_v23 = vmul.f32 %v1064_v3, %v1998_v11 }
 0x806   : > { %v1066_v24 = vadd.f32 1e-05, %v1065_v23 }
 0x808   : > { %1660 = vrsqrt.f32 %v1066_v24  ;;  %vm1073_vm14 = vweird.f32 %v1066_v24 }
 0x80e   : > { %v1661_v25 = vpop.eup %1660 }
 0x80f   : > { %v1068_v26 = vmul.f32 %v1661_v25, %v1066_v24  ;;  %vm1074_vm13 = vweird.f32 %v1661_v25 }
 0x810   : > { %vm1075_vm15 = vmor %vm1073_vm14, %vm1074_vm13 }
 0x811   : > { %v1069_v27 = vmul.f32 %v1661_v25, %v1068_v26 }
 0x813   : > { %v1070_v28 = vmul.f32 0.5, %v1069_v27 }
 0x815   : > { %v1071_v29 = vsub.f32 1.5, %v1070_v28 }
 0x817   : > { %v1072_v30 = vmul.f32 %v1661_v25, %v1071_v29 }
 0x819   : > { %v1076_v11 = vsel %vm1075_vm15, %v1661_v25, %v1072_v30 }
 0x81a   : > { %v1077_v32 = vmul.f32 %v1076_v11, %v1060_v18 }
 0x81c   : > { %v1081_v34 = vmul.f32 %v1636_v31, %v1077_v32 }
 0x81e   : > { %v1085_v35 = vadd.f32 %v1637_v33, %v1081_v34 }
 0x820   : > { %v1086_v36 = vpack.c.bf16 %v1085_v35, %v1085_v35 }
 0x822   : > { %1489 = vmatmul.msk.bf16.vlgmr.msra.gmra.mxu1 %vm680_vm1, %v1086_v36 }
 0x89f   : > { %v1119_v46 = vpop.f32.mrf.mxu1 }
 0x8a0   : > { %v1120_v47 = vadd.f32 %v1638_v45, %v1119_v46 }
 0x8a2   : > { %v1490_v48 = vmul.f32 -1.702, %v1120_v47 }
 0x8a4   : > { %v1125_v49 = vmul.f32 1.442695, %v1490_v48 }
 0x8a6   : > { %1662 = vpow2.f32 %v1125_v49 }
 0x8a7   : > { %v1121_v50 = vpop.f32.mrf.mxu1 }
 0x8ac   : > { %v1663_v51 = vpop.eup %1662 }
 0x8ad   : > { %v1127_v52 = vadd.f32 1.0, %v1663_v51 }
 0x8af   : > { %1664 = vrcp.f32 %v1127_v52  ;;  %v1139_v56 = vand.u32 2147483648, %v1127_v52  ;;  %v1137_v58 = vand.u32 2147483647, %v1127_v52  ;;  %vm1133_vm2 = vweird.f32 %v1127_v52 }
 0x8b1   : > { %v1140_v60 = vor.u32 1.1754944e-38, %v1139_v56  ;;  %vm1138_vm4 = vcmp.eq.f32.partialorder %v1137_v58, 8.507059e+37 }
 0x8b5   : > { %v1665_v53 = vpop.eup %1664 }
 0x8b6   : > { %v1129_v54 = vmul.f32 %v1665_v53, %v1127_v52  ;;  %vm1134_vm0 = vweird.f32 %v1665_v53 }
 0x8b7   : > { %vm1135_vm3 = vmor %vm1133_vm2, %vm1134_vm0 }
 0x8b8   : > { %v1130_v55 = vsub.f32 1.0, %v1129_v54 }
 0x8ba   : > { %v1131_v57 = vmul.f32 %v1665_v53, %v1130_v55 }
 0x8bc   : > { %v1132_v59 = vadd.f32 %v1665_v53, %v1131_v57 }
 0x8be   : > { %v1136_v61 = vsel %vm1135_vm3, %v1665_v53, %v1132_v59 }
 0x8bf   : > { %v1141_v62 = vsel %vm1138_vm4, %v1140_v60, %v1136_v61 }
 0x8c0   : > { %v1143_v63 = vmul.f32 %v1141_v62, %v1120_v47 }
 0x8c2   : > { %v1144_v0 = vpack.c.bf16 %v1143_v63, %v1143_v63 }
 0x8c4   : > { %1221 = vmatmul.bf16.vlgmr.msrb.gmra.mxu3 %v1144_v0 }
 0x947   : > { %v1222_v2 = vpop.f32.mrf.mxu3 }
 0x948   : > { %v1223_v4 = vadd.f32 %v1639_v1, %v1222_v2 }
 0x94a   : > { %v1226_v5 = vadd.f32 %v1223_v4, %v2072_v13 }
 0x94b   : > { %1231 = sbr.rel (%p1523_p1) target bundleno = 2385 (0x951), region = 84 }
 0x94c   : > { %1227 = vst.msk [vmem:[#allocation2] sm:$0xff] %vm680_vm1, %v1226_v5 }
 0x94f   : > { %v1224_v6 = vpop.f32.mrf.mxu3 }
 0x950   : > { %1232 = vst.msk [vmem:[%s618_s30] sm:$0xff] %vm680_vm1, %v1226_v5 }
 0x951 PF: > { %s2227_s21 = sld [smem:[#allocation11_spill]]  ;;  %s1246_s16 = sshll.u32 %s618_s30, 4  ;;  %s1247_s16 = int_to_ptr.vmem [resolvable:$true] %s1246_s16 }
 0x952   : > { %s2228_s14 = sld [smem:[#allocation8_spill]] }
 0x953   : > { %s2230_s3 = sld [smem:[#allocation25_spill]] }
 0x957   : > { %s1525_s29 = sshll.u32 %s2227_s21, 3 }
 0x958   : > { %s2231_s0 = sand.u32 1, %s2228_s14  }
 0x959   : > { %s1244_s25 = scalar_lea.hbm %s2230_s3, %s1525_s29  ;;  %s1234_s18 = scalar_lea.sflag [#allocation5], %s2231_s0 }
 0x95a   : > { %s1248_s6 = sshll.u32 %s1244_s25, 4  ;;  %s1686_s27 = scalar_lea.hbm %s2230_s3, 16  ;;  %s1249_s6 = int_to_ptr.hbm [resolvable:$true] %s1248_s6 }
 0x95b   : > { %s1680_s22 = sshra.s32 %s1249_s6, 4  ;;  %s1681_s22 = int_to_ptr.hbm [resolvable:$true] %s1680_s22 }
 0x95c   : > { %s1682_s1 = scalar_lea.hbm %s1681_s22, 8  ;;  %p1687_p6 = scmp.lt.s32.totalorder %s1681_s22, %s2230_s3 }
 0x95d   : > { %p1683_p2 = scmp.ne.s32.totalorder %s1681_s22, %s1682_s1  ;;  %p1688_p7 = scmp.lt.s32.totalorder %s1686_s27, %s1682_s1 }
 0x95f   : > { %p1684_p4 = pnand %p1683_p2, %p1901_p3  ;;  %p1689_p8 = por %p1688_p7, %p1687_p6 }
 0x961   : > { %p1685_p5 = pneg %p1684_p4 }
 0x963   : > { %p1690_p10 = pnand %p1689_p8, %p1685_p5 }
 0x965   : > { %1693 = shalt.err (!%p1690_p10)
}
 0x966   : > { %1546 = dma.vmem_to_hbm [thread:$0]  (%p1901_p3), %s1247_s16, 128, %s1249_s6, %s1234_s18  }
 0x967 PF: > { %s2232_s23 = sld [smem:[#allocation14_spill]] }
 0x968   : > { %s2233_s30 = sld [smem:[#allocation7_spill]] }
 0x96d   : > { %p1552_p11 = scmp.ge.s32.totalorder %s2232_s23, 2 }
 0x96e   : > { %s1260_s21 = sand.u32 1, %s2233_s30  }
 0x96f   : > { %p1549_p12 = pnand %p1552_p11, %p1911_p9  ;;  %s1261_s14 = scalar_lea.sflag [#allocation5], %s1260_s21 }
 0x971   : > { %p1550_p13 = pneg %p1549_p12 }
 0x973   : > { %1727 = dma.done.wait (%p1550_p13), %s1261_s14, 128  }
 0x974   : > { %1729 = vsyncadd (%p1550_p13), %s1261_s14, 4294967168  ;;  %s27_s20 = sadd.s32 1, %s2232_s23   ;;  %s2235_s29 = sld [smem:[#allocation8_spill]] }
 0x975   : > { %p24_p0 = scmp.ge.s32.totalorder %s27_s20, 6   ;;  %s2236_s30 = sld [smem:[#allocation9_spill]] }
 0x976   : > { %s2237_s15 = sld [smem:[#allocation19_spill]] }
 0x977   : > { %s2238_s16 = sld [smem:[#allocation12_spill]]  ;;  %26 = sbr.rel (!%p24_p0) target bundleno = 12 (0xc), region = 155 }
 0x978   : > { %s2239_s17 = sld [smem:[#allocation13_spill]] }
 0x979   : > { %s2240_s18 = sld [smem:[#allocation15_spill]] }
 0x97a   : > { %s2241_s19 = sld [smem:[#allocation17_spill]] }
 0x97c   :  { %1267 = vsyncpa [#allocation5], 1 }
 0x97d   :  { %1269 = vsyncpa [#allocation5 + $0x1], 1 }

</bundles_post_ra>
